<compile_context>
chip_gen: v7x
topology: tpu7x:2x2x1
jax: 0.10.0
libtpu: 0.0.40
codegen_flags: <defaults>
</compile_context>

<pallas_src>
import functools

import jax
import jax.numpy as jnp
from jax.experimental import pallas as pl
from jax.experimental.pallas import tpu as pltpu


def rnn_predictor_kernel(
    # inputs
    x_ref,      # (T*B, F)    f32   all timesteps, flattened
    h0_ref,     # (L, B, H)   f32
    c0_ref,     # (L, B, H)   f32
    we_t_ref,   # (F, H)      bf16  encoder weight, pre-transposed
    be_ref,     # (1, H)      f32   encoder bias
    wih_t_ref,  # (L, H, 4H)  bf16  W_ih^T per layer
    whh_t_ref,  # (L, H, 4H)  bf16  W_hh^T per layer
    b_ref,      # (L, 1, 4H)  f32   pre-summed b_ih + b_hh
    wd_t_ref,   # (H, D)      bf16  decoder weight, pre-transposed
    bd_ref,     # (1, D)      f32   decoder bias
    # outputs
    dec_ref,    # (T*B, D)    f32
    hT_ref,     # (L, B, H)   f32
    cT_ref,     # (L, B, H)   f32
    # scratch
    out_scr,    # VMEM (T*B, H) f32  per-layer outputs over all timesteps
    *,
    seq_len: int,
    batch: int,
    nlayers: int,
    hid: int,
):
    T, B, L, H = seq_len, batch, nlayers, hid

    # ----- encoder: one (T*B, F) x (F, H) matmul, hoisted off the serial path -----
    emb = (jnp.dot(x_ref[...].astype(jnp.bfloat16), we_t_ref[...],
                   preferred_element_type=jnp.float32)
           + be_ref[...])                                   # (T*B, H) f32
    layer_in = emb                                          # dropout = identity (eval)

    # ----- stacked LSTM, layer-major -----
    for l in range(L):
        # Hoisted input projection for ALL timesteps of this layer (one MXU matmul),
        # bias added once (not per-step).
        gx = (jnp.dot(layer_in.astype(jnp.bfloat16), wih_t_ref[l],
                      preferred_element_type=jnp.float32)
              + b_ref[l])                                   # (T*B, 4H) f32
        whh_l = whh_t_ref[l]                                # (H, 4H) bf16, loop-invariant RHS
        h = h0_ref[l]                                       # (B, H) f32
        c = c0_ref[l]                                       # (B, H) f32

        # Serial recurrence: per step only a (B, H) x (H, 4H) matmul on the MXU.
        for t in range(T):                                  # fully unrolled (T small)
            gates = gx[t * B:(t + 1) * B, :] + jnp.dot(
                h.astype(jnp.bfloat16), whh_l,
                preferred_element_type=jnp.float32)         # (B, 4H) f32
            # Activate the full 4H=128-lane vreg (EUP slot), then slice. PyTorch gate
            # order is [i, f, g, o].
            sig = jax.nn.sigmoid(gates)
            th = jnp.tanh(gates)
            i_g = sig[:, 0 * H:1 * H]
            f_g = sig[:, 1 * H:2 * H]
            g_g = th[:, 2 * H:3 * H]
            o_g = sig[:, 3 * H:4 * H]
            c = f_g * c + i_g * g_g
            h = o_g * jnp.tanh(c)
            out_scr[t * B:(t + 1) * B, :] = h               # off the h->h dependency chain

        hT_ref[l] = h
        cT_ref[l] = c
        layer_in = out_scr[...]                             # (T*B, H) input to next layer
        # inter-layer dropout is identity in eval

    # ----- decoder: one matmul over all timesteps, single writeback -----
    dec_ref[...] = (jnp.dot(layer_in.astype(jnp.bfloat16), wd_t_ref[...],
                            preferred_element_type=jnp.float32)
                    + bd_ref[...])


def rnn_predictor_forward(x, h0, c0, params, *, nlayers, hid):
    """x: (T, B, F) f32.  h0, c0: (L, B, H) f32.  Returns (decoded, (hT, cT))."""
    T, B, F = x.shape
    L, _, H = h0.shape
    assert L == nlayers and H == hid
    D = params["wd"].shape[0]
    # Module convention: emb.view(-1, bsz, rnn_hid_size) requires rnn_inp_size == rnn_hid_size.
    assert params["we"].shape[0] == H, "rnn_inp_size must equal rnn_hid_size"
    assert params["wih"].shape == (L, 4 * H, H), "layer-0 W_ih must be (4H, H)"

    # Wrapper-side layout plumbing (free): pre-transpose weights, pre-sum the two LSTM
    # biases, cast MXU operands to bf16 (accumulation stays f32 in-kernel).
    we_t = params["we"].T.astype(jnp.bfloat16)                             # (F, H)
    be = params["be"].reshape(1, H).astype(jnp.float32)
    wih_t = jnp.transpose(params["wih"], (0, 2, 1)).astype(jnp.bfloat16)   # (L, H, 4H)
    whh_t = jnp.transpose(params["whh"], (0, 2, 1)).astype(jnp.bfloat16)   # (L, H, 4H)
    bsum = (params["bih"] + params["bhh"]).reshape(L, 1, 4 * H)            # (L, 1, 4H)
    wd_t = params["wd"].T.astype(jnp.bfloat16)                             # (H, D)
    bd = params["bd"].reshape(1, D).astype(jnp.float32)

    x2 = x.reshape(T * B, F)

    kernel = functools.partial(rnn_predictor_kernel,
                               seq_len=T, batch=B, nlayers=L, hid=H)

    full = lambda shape: pl.BlockSpec(shape, lambda i: (0,) * len(shape))

    dec2, hT, cT = pl.pallas_call(
        kernel,
        out_shape=(
            jax.ShapeDtypeStruct((T * B, D), jnp.float32),
            jax.ShapeDtypeStruct((L, B, H), jnp.float32),
            jax.ShapeDtypeStruct((L, B, H), jnp.float32),
        ),
        grid_spec=pltpu.PrefetchScalarGridSpec(
            num_scalar_prefetch=0,
            grid=(1,),                          # single step: whole recurrence in-kernel
            in_specs=[
                full((T * B, F)),               # x (all timesteps)
                full((L, B, H)),                # h0
                full((L, B, H)),                # c0
                full((F, H)),                   # encoder weight^T   (bf16)
                full((1, H)),                   # encoder bias
                full((L, H, 4 * H)),            # W_ih^T per layer   (bf16)
                full((L, H, 4 * H)),            # W_hh^T per layer   (bf16)
                full((L, 1, 4 * H)),            # fused bias
                full((H, D)),                   # decoder weight^T   (bf16)
                full((1, D)),                   # decoder bias
            ],
            out_specs=[
                full((T * B, D)),               # decoded, written once at the end
                full((L, B, H)),                # final h
                full((L, B, H)),                # final c
            ],
            scratch_shapes=[
                pltpu.VMEM((T * B, H), jnp.float32),   # per-layer outputs (no (T,B,H) padding)
            ],
        ),
        compiler_params=pltpu.CompilerParams(
            dimension_semantics=("arbitrary",),        # single sequential step
        ),
    )(x2, h0, c0, we_t, be, wih_t, whh_t, bsum, wd_t, bd)

    return dec2.reshape(T, B, D), (hT, cT)


def reference_forward(x, h0, c0, params, *, nlayers, hid):
    """Pure-JAX f32 reference mirroring the PyTorch forward (eval mode)."""
    T, B, F = x.shape
    emb = jnp.einsum("tbf,hf->tbh", x, params["we"]) + params["be"][0]
    h = [h0[l] for l in range(nlayers)]
    c = [c0[l] for l in range(nlayers)]
    outs = []
    for t in range(T):
        inp = emb[t]
        for l in range(nlayers):
            gates = (inp @ params["wih"][l].T + h[l] @ params["whh"][l].T
                     + params["bih"][l] + params["bhh"][l])
            i_g = jax.nn.sigmoid(gates[:, 0 * hid:1 * hid])
            f_g = jax.nn.sigmoid(gates[:, 1 * hid:2 * hid])
            g_g = jnp.tanh(gates[:, 2 * hid:3 * hid])
            o_g = jax.nn.sigmoid(gates[:, 3 * hid:4 * hid])
            c[l] = f_g * c[l] + i_g * g_g
            h[l] = o_g * jnp.tanh(c[l])
            inp = h[l]
        outs.append(inp)
    out = jnp.stack(outs, axis=0)
    dec = jnp.einsum("tbh,dh->tbd", out, params["wd"]) + params["bd"][0]
    return dec, (jnp.stack(h, 0), jnp.stack(c, 0))


if __name__ == "__main__":
    # Module config: enc_inp_size = dec_out_size = 4, rnn_inp_size = rnn_hid_size = 32, nlayers = 2.
    T, B, F, H, L = 8, 2, 4, 32, 2
    D = F

    key = jax.random.PRNGKey(0)
    ks = jax.random.split(key, 10)
    s = 1.0 / jnp.sqrt(jnp.float32(H))
    params = {
        "we":  jax.random.uniform(ks[0], (H, F), jnp.float32, -0.1, 0.1),
        "be":  jax.random.uniform(ks[1], (1, H), jnp.float32, -0.1, 0.1),
        "wih": jax.random.uniform(ks[2], (L, 4 * H, H), jnp.float32, -s, s),
        "whh": jax.random.uniform(ks[3], (L, 4 * H, H), jnp.float32, -s, s),
        "bih": jax.random.uniform(ks[4], (L, 4 * H), jnp.float32, -s, s),
        "bhh": jax.random.uniform(ks[5], (L, 4 * H), jnp.float32, -s, s),
        "wd":  jax.random.uniform(ks[6], (D, H), jnp.float32, -0.1, 0.1),
        "bd":  jnp.zeros((1, D), jnp.float32),
    }

    x = jax.random.normal(ks[7], (T, B, F), jnp.float32)
    h0 = jnp.zeros((L, B, H), jnp.float32)   # init_hidden(bsz)
    c0 = jnp.zeros((L, B, H), jnp.float32)

    dec, (hT, cT) = rnn_predictor_forward(x, h0, c0, params, nlayers=L, hid=H)
    jax.block_until_ready((dec, hT, cT))

    dec_ref, (hT_ref, cT_ref) = reference_forward(x, h0, c0, params, nlayers=L, hid=H)
    # bf16 MXU operands vs. f32 reference -> looser tolerance (per perf review).
    assert jnp.allclose(dec, dec_ref, atol=5e-2, rtol=5e-2), "decoded mismatch"
    assert jnp.allclose(hT, hT_ref, atol=5e-2, rtol=5e-2), "h_T mismatch"
    assert jnp.allclose(cT, cT_ref, atol=5e-2, rtol=5e-2), "c_T mismatch"

    print("KERNEL_OK")
</pallas_src>

<mosaic_0001>
module attributes {stable_mosaic.version = 11 : i64} {
  func.func @rnn_predictor_kernel(%arg0: i32, %arg1: memref<16x4xf32, #tpu.memory_space<vmem>>, %arg2: memref<2x2x32xf32, #tpu.memory_space<vmem>>, %arg3: memref<2x2x32xf32, #tpu.memory_space<vmem>>, %arg4: memref<4x32xbf16, #tpu.memory_space<vmem>>, %arg5: memref<1x32xf32, #tpu.memory_space<vmem>>, %arg6: memref<2x32x128xbf16, #tpu.memory_space<vmem>>, %arg7: memref<2x32x128xbf16, #tpu.memory_space<vmem>>, %arg8: memref<2x1x128xf32, #tpu.memory_space<vmem>>, %arg9: memref<32x4xbf16, #tpu.memory_space<vmem>>, %arg10: memref<1x4xf32, #tpu.memory_space<vmem>>, %arg11: memref<16x4xf32, #tpu.memory_space<vmem>>, %arg12: memref<2x2x32xf32, #tpu.memory_space<vmem>>, %arg13: memref<2x2x32xf32, #tpu.memory_space<vmem>>, %arg14: memref<16x32xf32, #tpu.memory_space<vmem>>) attributes {dimension_semantics = [#tpu.dimension_semantics<arbitrary>], iteration_bounds = array<i64: 1>, scalar_prefetch = 0 : i64, scratch_operands = 1 : i64, tpu.core_type = #tpu.core_type<tc>, window_params = [{pipeline_mode = #tpu.pipeline_mode<synchronous>, transform_indices = @transform_0, window_bounds = array<i64: 16, 4>}, {pipeline_mode = #tpu.pipeline_mode<synchronous>, transform_indices = @transform_1, window_bounds = array<i64: 2, 2, 32>}, {pipeline_mode = #tpu.pipeline_mode<synchronous>, transform_indices = @transform_2, window_bounds = array<i64: 2, 2, 32>}, {pipeline_mode = #tpu.pipeline_mode<synchronous>, transform_indices = @transform_3, window_bounds = array<i64: 4, 32>}, {pipeline_mode = #tpu.pipeline_mode<synchronous>, transform_indices = @transform_4, window_bounds = array<i64: 1, 32>}, {pipeline_mode = #tpu.pipeline_mode<synchronous>, transform_indices = @transform_5, window_bounds = array<i64: 2, 32, 128>}, {pipeline_mode = #tpu.pipeline_mode<synchronous>, transform_indices = @transform_6, window_bounds = array<i64: 2, 32, 128>}, {pipeline_mode = #tpu.pipeline_mode<synchronous>, transform_indices = @transform_7, window_bounds = array<i64: 2, 1, 128>}, {pipeline_mode = #tpu.pipeline_mode<synchronous>, transform_indices = @transform_8, window_bounds = array<i64: 32, 4>}, {pipeline_mode = #tpu.pipeline_mode<synchronous>, transform_indices = @transform_9, window_bounds = array<i64: 1, 4>}, {pipeline_mode = #tpu.pipeline_mode<synchronous>, transform_indices = @transform_10, window_bounds = array<i64: 16, 4>}, {pipeline_mode = #tpu.pipeline_mode<synchronous>, transform_indices = @transform_11, window_bounds = array<i64: 2, 2, 32>}, {pipeline_mode = #tpu.pipeline_mode<synchronous>, transform_indices = @transform_12, window_bounds = array<i64: 2, 2, 32>}]} {
    %c0 = arith.constant 0 : index
    %c0_0 = arith.constant 0 : index
    %0 = vector.load %arg1[%c0, %c0_0] : memref<16x4xf32, #tpu.memory_space<vmem>>, vector<16x4xf32>
    %1 = arith.truncf %0 : vector<16x4xf32> to vector<16x4xbf16>
    %c0_1 = arith.constant 0 : index
    %c0_2 = arith.constant 0 : index
    %2 = vector.load %arg4[%c0_1, %c0_2] : memref<4x32xbf16, #tpu.memory_space<vmem>>, vector<4x32xbf16>
    %cst = arith.constant dense<0.000000e+00> : vector<16x32xf32>
    %3 = tpu.matmul %1, %2, %cst {dimension_numbers = #tpu.dot_dimension_numbers<[1], [0], [0], [1], [0, 0, 1, 1], [], []>} : vector<16x4xbf16>, vector<4x32xbf16>, vector<16x32xf32> -> vector<16x32xf32>
    %c0_3 = arith.constant 0 : index
    %c0_4 = arith.constant 0 : index
    %4 = vector.load %arg5[%c0_3, %c0_4] : memref<1x32xf32, #tpu.memory_space<vmem>>, vector<1x32xf32>
    %5 = vector.broadcast %4 : vector<1x32xf32> to vector<16x32xf32>
    %6 = arith.addf %3, %5 : vector<16x32xf32>
    %7 = arith.truncf %6 : vector<16x32xf32> to vector<16x32xbf16>
    %c0_5 = arith.constant 0 : index
    %c0_6 = arith.constant 0 : index
    %c0_7 = arith.constant 0 : index
    %8 = vector.load %arg6[%c0_5, %c0_6, %c0_7] : memref<2x32x128xbf16, #tpu.memory_space<vmem>>, vector<1x32x128xbf16>
    %9 = vector.shape_cast %8 : vector<1x32x128xbf16> to vector<32x128xbf16>
    %cst_8 = arith.constant dense<0.000000e+00> : vector<16x128xf32>
    %10 = tpu.matmul %7, %9, %cst_8 {dimension_numbers = #tpu.dot_dimension_numbers<[1], [0], [0], [1], [0, 0, 1, 1], [], []>} : vector<16x32xbf16>, vector<32x128xbf16>, vector<16x128xf32> -> vector<16x128xf32>
    %c0_9 = arith.constant 0 : index
    %c0_10 = arith.constant 0 : index
    %c0_11 = arith.constant 0 : index
    %11 = vector.load %arg8[%c0_9, %c0_10, %c0_11] : memref<2x1x128xf32, #tpu.memory_space<vmem>>, vector<1x1x128xf32>
    %12 = vector.shape_cast %11 : vector<1x1x128xf32> to vector<1x128xf32>
    %13 = vector.broadcast %12 : vector<1x128xf32> to vector<16x128xf32>
    %14 = arith.addf %10, %13 : vector<16x128xf32>
    %c0_12 = arith.constant 0 : index
    %c0_13 = arith.constant 0 : index
    %c0_14 = arith.constant 0 : index
    %15 = vector.load %arg7[%c0_12, %c0_13, %c0_14] : memref<2x32x128xbf16, #tpu.memory_space<vmem>>, vector<1x32x128xbf16>
    %16 = vector.shape_cast %15 : vector<1x32x128xbf16> to vector<32x128xbf16>
    %c0_15 = arith.constant 0 : index
    %c0_16 = arith.constant 0 : index
    %c0_17 = arith.constant 0 : index
    %17 = vector.load %arg2[%c0_15, %c0_16, %c0_17] : memref<2x2x32xf32, #tpu.memory_space<vmem>>, vector<1x2x32xf32>
    %18 = vector.shape_cast %17 : vector<1x2x32xf32> to vector<2x32xf32>
    %c0_18 = arith.constant 0 : index
    %c0_19 = arith.constant 0 : index
    %c0_20 = arith.constant 0 : index
    %19 = vector.load %arg3[%c0_18, %c0_19, %c0_20] : memref<2x2x32xf32, #tpu.memory_space<vmem>>, vector<1x2x32xf32>
    %20 = vector.shape_cast %19 : vector<1x2x32xf32> to vector<2x32xf32>
    %21 = vector.extract_strided_slice %14 {offsets = [0, 0], sizes = [2, 128], strides = [1, 1]} : vector<16x128xf32> to vector<2x128xf32>
    %22 = arith.truncf %18 : vector<2x32xf32> to vector<2x32xbf16>
    %cst_21 = arith.constant dense<0.000000e+00> : vector<2x128xf32>
    %23 = tpu.matmul %22, %16, %cst_21 {dimension_numbers = #tpu.dot_dimension_numbers<[1], [0], [0], [1], [0, 0, 1, 1], [], []>} : vector<2x32xbf16>, vector<32x128xbf16>, vector<2x128xf32> -> vector<2x128xf32>
    %24 = arith.addf %21, %23 : vector<2x128xf32>
    %25 = arith.negf %24 : vector<2x128xf32>
    %26 = math.exp %25 : vector<2x128xf32>
    %cst_22 = arith.constant 1.000000e+00 : f32
    %27 = vector.broadcast %cst_22 : f32 to vector<2x128xf32>
    %28 = arith.addf %27, %26 : vector<2x128xf32>
    %29 = arith.divf %27, %28 : vector<2x128xf32>
    %30 = math.tanh %24 : vector<2x128xf32>
    %31 = vector.extract_strided_slice %29 {offsets = [0, 0], sizes = [2, 32], strides = [1, 1]} : vector<2x128xf32> to vector<2x32xf32>
    %32 = vector.extract_strided_slice %29 {offsets = [0, 32], sizes = [2, 32], strides = [1, 1]} : vector<2x128xf32> to vector<2x32xf32>
    %33 = vector.extract_strided_slice %30 {offsets = [0, 64], sizes = [2, 32], strides = [1, 1]} : vector<2x128xf32> to vector<2x32xf32>
    %34 = vector.extract_strided_slice %29 {offsets = [0, 96], sizes = [2, 32], strides = [1, 1]} : vector<2x128xf32> to vector<2x32xf32>
    %35 = arith.mulf %32, %20 : vector<2x32xf32>
    %36 = arith.mulf %31, %33 : vector<2x32xf32>
    %37 = arith.addf %35, %36 : vector<2x32xf32>
    %38 = math.tanh %37 : vector<2x32xf32>
    %39 = arith.mulf %34, %38 : vector<2x32xf32>
    %c0_23 = arith.constant 0 : index
    %c0_24 = arith.constant 0 : index
    %40 = vector.load %arg14[%c0_23, %c0_24] : memref<16x32xf32, #tpu.memory_space<vmem>>, vector<2x32xf32>
    tpu.vector_store %arg14[%c0_23, %c0_24], %39 {strides = array<i32>} : memref<16x32xf32, #tpu.memory_space<vmem>>, vector<2x32xf32>,
    %41 = vector.extract_strided_slice %14 {offsets = [2, 0], sizes = [2, 128], strides = [1, 1]} : vector<16x128xf32> to vector<2x128xf32>
    %42 = arith.truncf %39 : vector<2x32xf32> to vector<2x32xbf16>
    %cst_25 = arith.constant dense<0.000000e+00> : vector<2x128xf32>
    %43 = tpu.matmul %42, %16, %cst_25 {dimension_numbers = #tpu.dot_dimension_numbers<[1], [0], [0], [1], [0, 0, 1, 1], [], []>} : vector<2x32xbf16>, vector<32x128xbf16>, vector<2x128xf32> -> vector<2x128xf32>
    %44 = arith.addf %41, %43 : vector<2x128xf32>
    %45 = arith.negf %44 : vector<2x128xf32>
    %46 = math.exp %45 : vector<2x128xf32>
    %cst_26 = arith.constant 1.000000e+00 : f32
    %47 = vector.broadcast %cst_26 : f32 to vector<2x128xf32>
    %48 = arith.addf %47, %46 : vector<2x128xf32>
    %49 = arith.divf %47, %48 : vector<2x128xf32>
    %50 = math.tanh %44 : vector<2x128xf32>
    %51 = vector.extract_strided_slice %49 {offsets = [0, 0], sizes = [2, 32], strides = [1, 1]} : vector<2x128xf32> to vector<2x32xf32>
    %52 = vector.extract_strided_slice %49 {offsets = [0, 32], sizes = [2, 32], strides = [1, 1]} : vector<2x128xf32> to vector<2x32xf32>
    %53 = vector.extract_strided_slice %50 {offsets = [0, 64], sizes = [2, 32], strides = [1, 1]} : vector<2x128xf32> to vector<2x32xf32>
    %54 = vector.extract_strided_slice %49 {offsets = [0, 96], sizes = [2, 32], strides = [1, 1]} : vector<2x128xf32> to vector<2x32xf32>
    %55 = arith.mulf %52, %37 : vector<2x32xf32>
    %56 = arith.mulf %51, %53 : vector<2x32xf32>
    %57 = arith.addf %55, %56 : vector<2x32xf32>
    %58 = math.tanh %57 : vector<2x32xf32>
    %59 = arith.mulf %54, %58 : vector<2x32xf32>
    %c2 = arith.constant 2 : index
    %c0_27 = arith.constant 0 : index
    %60 = vector.load %arg14[%c2, %c0_27] : memref<16x32xf32, #tpu.memory_space<vmem>>, vector<2x32xf32>
    tpu.vector_store %arg14[%c2, %c0_27], %59 {strides = array<i32>} : memref<16x32xf32, #tpu.memory_space<vmem>>, vector<2x32xf32>,
    %61 = vector.extract_strided_slice %14 {offsets = [4, 0], sizes = [2, 128], strides = [1, 1]} : vector<16x128xf32> to vector<2x128xf32>
    %62 = arith.truncf %59 : vector<2x32xf32> to vector<2x32xbf16>
    %cst_28 = arith.constant dense<0.000000e+00> : vector<2x128xf32>
    %63 = tpu.matmul %62, %16, %cst_28 {dimension_numbers = #tpu.dot_dimension_numbers<[1], [0], [0], [1], [0, 0, 1, 1], [], []>} : vector<2x32xbf16>, vector<32x128xbf16>, vector<2x128xf32> -> vector<2x128xf32>
    %64 = arith.addf %61, %63 : vector<2x128xf32>
    %65 = arith.negf %64 : vector<2x128xf32>
    %66 = math.exp %65 : vector<2x128xf32>
    %cst_29 = arith.constant 1.000000e+00 : f32
    %67 = vector.broadcast %cst_29 : f32 to vector<2x128xf32>
    %68 = arith.addf %67, %66 : vector<2x128xf32>
    %69 = arith.divf %67, %68 : vector<2x128xf32>
    %70 = math.tanh %64 : vector<2x128xf32>
    %71 = vector.extract_strided_slice %69 {offsets = [0, 0], sizes = [2, 32], strides = [1, 1]} : vector<2x128xf32> to vector<2x32xf32>
    %72 = vector.extract_strided_slice %69 {offsets = [0, 32], sizes = [2, 32], strides = [1, 1]} : vector<2x128xf32> to vector<2x32xf32>
    %73 = vector.extract_strided_slice %70 {offsets = [0, 64], sizes = [2, 32], strides = [1, 1]} : vector<2x128xf32> to vector<2x32xf32>
    %74 = vector.extract_strided_slice %69 {offsets = [0, 96], sizes = [2, 32], strides = [1, 1]} : vector<2x128xf32> to vector<2x32xf32>
    %75 = arith.mulf %72, %57 : vector<2x32xf32>
    %76 = arith.mulf %71, %73 : vector<2x32xf32>
    %77 = arith.addf %75, %76 : vector<2x32xf32>
    %78 = math.tanh %77 : vector<2x32xf32>
    %79 = arith.mulf %74, %78 : vector<2x32xf32>
    %c4 = arith.constant 4 : index
    %c0_30 = arith.constant 0 : index
    %80 = vector.load %arg14[%c4, %c0_30] : memref<16x32xf32, #tpu.memory_space<vmem>>, vector<2x32xf32>
    tpu.vector_store %arg14[%c4, %c0_30], %79 {strides = array<i32>} : memref<16x32xf32, #tpu.memory_space<vmem>>, vector<2x32xf32>,
    %81 = vector.extract_strided_slice %14 {offsets = [6, 0], sizes = [2, 128], strides = [1, 1]} : vector<16x128xf32> to vector<2x128xf32>
    %82 = arith.truncf %79 : vector<2x32xf32> to vector<2x32xbf16>
    %cst_31 = arith.constant dense<0.000000e+00> : vector<2x128xf32>
    %83 = tpu.matmul %82, %16, %cst_31 {dimension_numbers = #tpu.dot_dimension_numbers<[1], [0], [0], [1], [0, 0, 1, 1], [], []>} : vector<2x32xbf16>, vector<32x128xbf16>, vector<2x128xf32> -> vector<2x128xf32>
    %84 = arith.addf %81, %83 : vector<2x128xf32>
    %85 = arith.negf %84 : vector<2x128xf32>
    %86 = math.exp %85 : vector<2x128xf32>
    %cst_32 = arith.constant 1.000000e+00 : f32
    %87 = vector.broadcast %cst_32 : f32 to vector<2x128xf32>
    %88 = arith.addf %87, %86 : vector<2x128xf32>
    %89 = arith.divf %87, %88 : vector<2x128xf32>
    %90 = math.tanh %84 : vector<2x128xf32>
    %91 = vector.extract_strided_slice %89 {offsets = [0, 0], sizes = [2, 32], strides = [1, 1]} : vector<2x128xf32> to vector<2x32xf32>
    %92 = vector.extract_strided_slice %89 {offsets = [0, 32], sizes = [2, 32], strides = [1, 1]} : vector<2x128xf32> to vector<2x32xf32>
    %93 = vector.extract_strided_slice %90 {offsets = [0, 64], sizes = [2, 32], strides = [1, 1]} : vector<2x128xf32> to vector<2x32xf32>
    %94 = vector.extract_strided_slice %89 {offsets = [0, 96], sizes = [2, 32], strides = [1, 1]} : vector<2x128xf32> to vector<2x32xf32>
    %95 = arith.mulf %92, %77 : vector<2x32xf32>
    %96 = arith.mulf %91, %93 : vector<2x32xf32>
    %97 = arith.addf %95, %96 : vector<2x32xf32>
    %98 = math.tanh %97 : vector<2x32xf32>
    %99 = arith.mulf %94, %98 : vector<2x32xf32>
    %c6 = arith.constant 6 : index
    %c0_33 = arith.constant 0 : index
    %100 = vector.load %arg14[%c6, %c0_33] : memref<16x32xf32, #tpu.memory_space<vmem>>, vector<2x32xf32>
    tpu.vector_store %arg14[%c6, %c0_33], %99 {strides = array<i32>} : memref<16x32xf32, #tpu.memory_space<vmem>>, vector<2x32xf32>,
    %101 = vector.extract_strided_slice %14 {offsets = [8, 0], sizes = [2, 128], strides = [1, 1]} : vector<16x128xf32> to vector<2x128xf32>
    %102 = arith.truncf %99 : vector<2x32xf32> to vector<2x32xbf16>
    %cst_34 = arith.constant dense<0.000000e+00> : vector<2x128xf32>
    %103 = tpu.matmul %102, %16, %cst_34 {dimension_numbers = #tpu.dot_dimension_numbers<[1], [0], [0], [1], [0, 0, 1, 1], [], []>} : vector<2x32xbf16>, vector<32x128xbf16>, vector<2x128xf32> -> vector<2x128xf32>
    %104 = arith.addf %101, %103 : vector<2x128xf32>
    %105 = arith.negf %104 : vector<2x128xf32>
    %106 = math.exp %105 : vector<2x128xf32>
    %cst_35 = arith.constant 1.000000e+00 : f32
    %107 = vector.broadcast %cst_35 : f32 to vector<2x128xf32>
    %108 = arith.addf %107, %106 : vector<2x128xf32>
    %109 = arith.divf %107, %108 : vector<2x128xf32>
    %110 = math.tanh %104 : vector<2x128xf32>
    %111 = vector.extract_strided_slice %109 {offsets = [0, 0], sizes = [2, 32], strides = [1, 1]} : vector<2x128xf32> to vector<2x32xf32>
    %112 = vector.extract_strided_slice %109 {offsets = [0, 32], sizes = [2, 32], strides = [1, 1]} : vector<2x128xf32> to vector<2x32xf32>
    %113 = vector.extract_strided_slice %110 {offsets = [0, 64], sizes = [2, 32], strides = [1, 1]} : vector<2x128xf32> to vector<2x32xf32>
    %114 = vector.extract_strided_slice %109 {offsets = [0, 96], sizes = [2, 32], strides = [1, 1]} : vector<2x128xf32> to vector<2x32xf32>
    %115 = arith.mulf %112, %97 : vector<2x32xf32>
    %116 = arith.mulf %111, %113 : vector<2x32xf32>
    %117 = arith.addf %115, %116 : vector<2x32xf32>
    %118 = math.tanh %117 : vector<2x32xf32>
    %119 = arith.mulf %114, %118 : vector<2x32xf32>
    %c8 = arith.constant 8 : index
    %c0_36 = arith.constant 0 : index
    %120 = vector.load %arg14[%c8, %c0_36] : memref<16x32xf32, #tpu.memory_space<vmem>>, vector<2x32xf32>
    tpu.vector_store %arg14[%c8, %c0_36], %119 {strides = array<i32>} : memref<16x32xf32, #tpu.memory_space<vmem>>, vector<2x32xf32>,
    %121 = vector.extract_strided_slice %14 {offsets = [10, 0], sizes = [2, 128], strides = [1, 1]} : vector<16x128xf32> to vector<2x128xf32>
    %122 = arith.truncf %119 : vector<2x32xf32> to vector<2x32xbf16>
    %cst_37 = arith.constant dense<0.000000e+00> : vector<2x128xf32>
    %123 = tpu.matmul %122, %16, %cst_37 {dimension_numbers = #tpu.dot_dimension_numbers<[1], [0], [0], [1], [0, 0, 1, 1], [], []>} : vector<2x32xbf16>, vector<32x128xbf16>, vector<2x128xf32> -> vector<2x128xf32>
    %124 = arith.addf %121, %123 : vector<2x128xf32>
    %125 = arith.negf %124 : vector<2x128xf32>
    %126 = math.exp %125 : vector<2x128xf32>
    %cst_38 = arith.constant 1.000000e+00 : f32
    %127 = vector.broadcast %cst_38 : f32 to vector<2x128xf32>
    %128 = arith.addf %127, %126 : vector<2x128xf32>
    %129 = arith.divf %127, %128 : vector<2x128xf32>
    %130 = math.tanh %124 : vector<2x128xf32>
    %131 = vector.extract_strided_slice %129 {offsets = [0, 0], sizes = [2, 32], strides = [1, 1]} : vector<2x128xf32> to vector<2x32xf32>
    %132 = vector.extract_strided_slice %129 {offsets = [0, 32], sizes = [2, 32], strides = [1, 1]} : vector<2x128xf32> to vector<2x32xf32>
    %133 = vector.extract_strided_slice %130 {offsets = [0, 64], sizes = [2, 32], strides = [1, 1]} : vector<2x128xf32> to vector<2x32xf32>
    %134 = vector.extract_strided_slice %129 {offsets = [0, 96], sizes = [2, 32], strides = [1, 1]} : vector<2x128xf32> to vector<2x32xf32>
    %135 = arith.mulf %132, %117 : vector<2x32xf32>
    %136 = arith.mulf %131, %133 : vector<2x32xf32>
    %137 = arith.addf %135, %136 : vector<2x32xf32>
    %138 = math.tanh %137 : vector<2x32xf32>
    %139 = arith.mulf %134, %138 : vector<2x32xf32>
    %c10 = arith.constant 10 : index
    %c0_39 = arith.constant 0 : index
    %140 = vector.load %arg14[%c10, %c0_39] : memref<16x32xf32, #tpu.memory_space<vmem>>, vector<2x32xf32>
    tpu.vector_store %arg14[%c10, %c0_39], %139 {strides = array<i32>} : memref<16x32xf32, #tpu.memory_space<vmem>>, vector<2x32xf32>,
    %141 = vector.extract_strided_slice %14 {offsets = [12, 0], sizes = [2, 128], strides = [1, 1]} : vector<16x128xf32> to vector<2x128xf32>
    %142 = arith.truncf %139 : vector<2x32xf32> to vector<2x32xbf16>
    %cst_40 = arith.constant dense<0.000000e+00> : vector<2x128xf32>
    %143 = tpu.matmul %142, %16, %cst_40 {dimension_numbers = #tpu.dot_dimension_numbers<[1], [0], [0], [1], [0, 0, 1, 1], [], []>} : vector<2x32xbf16>, vector<32x128xbf16>, vector<2x128xf32> -> vector<2x128xf32>
    %144 = arith.addf %141, %143 : vector<2x128xf32>
    %145 = arith.negf %144 : vector<2x128xf32>
    %146 = math.exp %145 : vector<2x128xf32>
    %cst_41 = arith.constant 1.000000e+00 : f32
    %147 = vector.broadcast %cst_41 : f32 to vector<2x128xf32>
    %148 = arith.addf %147, %146 : vector<2x128xf32>
    %149 = arith.divf %147, %148 : vector<2x128xf32>
    %150 = math.tanh %144 : vector<2x128xf32>
    %151 = vector.extract_strided_slice %149 {offsets = [0, 0], sizes = [2, 32], strides = [1, 1]} : vector<2x128xf32> to vector<2x32xf32>
    %152 = vector.extract_strided_slice %149 {offsets = [0, 32], sizes = [2, 32], strides = [1, 1]} : vector<2x128xf32> to vector<2x32xf32>
    %153 = vector.extract_strided_slice %150 {offsets = [0, 64], sizes = [2, 32], strides = [1, 1]} : vector<2x128xf32> to vector<2x32xf32>
    %154 = vector.extract_strided_slice %149 {offsets = [0, 96], sizes = [2, 32], strides = [1, 1]} : vector<2x128xf32> to vector<2x32xf32>
    %155 = arith.mulf %152, %137 : vector<2x32xf32>
    %156 = arith.mulf %151, %153 : vector<2x32xf32>
    %157 = arith.addf %155, %156 : vector<2x32xf32>
    %158 = math.tanh %157 : vector<2x32xf32>
    %159 = arith.mulf %154, %158 : vector<2x32xf32>
    %c12 = arith.constant 12 : index
    %c0_42 = arith.constant 0 : index
    %160 = vector.load %arg14[%c12, %c0_42] : memref<16x32xf32, #tpu.memory_space<vmem>>, vector<2x32xf32>
    tpu.vector_store %arg14[%c12, %c0_42], %159 {strides = array<i32>} : memref<16x32xf32, #tpu.memory_space<vmem>>, vector<2x32xf32>,
    %161 = vector.extract_strided_slice %14 {offsets = [14, 0], sizes = [2, 128], strides = [1, 1]} : vector<16x128xf32> to vector<2x128xf32>
    %162 = arith.truncf %159 : vector<2x32xf32> to vector<2x32xbf16>
    %cst_43 = arith.constant dense<0.000000e+00> : vector<2x128xf32>
    %163 = tpu.matmul %162, %16, %cst_43 {dimension_numbers = #tpu.dot_dimension_numbers<[1], [0], [0], [1], [0, 0, 1, 1], [], []>} : vector<2x32xbf16>, vector<32x128xbf16>, vector<2x128xf32> -> vector<2x128xf32>
    %164 = arith.addf %161, %163 : vector<2x128xf32>
    %165 = arith.negf %164 : vector<2x128xf32>
    %166 = math.exp %165 : vector<2x128xf32>
    %cst_44 = arith.constant 1.000000e+00 : f32
    %167 = vector.broadcast %cst_44 : f32 to vector<2x128xf32>
    %168 = arith.addf %167, %166 : vector<2x128xf32>
    %169 = arith.divf %167, %168 : vector<2x128xf32>
    %170 = math.tanh %164 : vector<2x128xf32>
    %171 = vector.extract_strided_slice %169 {offsets = [0, 0], sizes = [2, 32], strides = [1, 1]} : vector<2x128xf32> to vector<2x32xf32>
    %172 = vector.extract_strided_slice %169 {offsets = [0, 32], sizes = [2, 32], strides = [1, 1]} : vector<2x128xf32> to vector<2x32xf32>
    %173 = vector.extract_strided_slice %170 {offsets = [0, 64], sizes = [2, 32], strides = [1, 1]} : vector<2x128xf32> to vector<2x32xf32>
    %174 = vector.extract_strided_slice %169 {offsets = [0, 96], sizes = [2, 32], strides = [1, 1]} : vector<2x128xf32> to vector<2x32xf32>
    %175 = arith.mulf %172, %157 : vector<2x32xf32>
    %176 = arith.mulf %171, %173 : vector<2x32xf32>
    %177 = arith.addf %175, %176 : vector<2x32xf32>
    %178 = math.tanh %177 : vector<2x32xf32>
    %179 = arith.mulf %174, %178 : vector<2x32xf32>
    %c14 = arith.constant 14 : index
    %c0_45 = arith.constant 0 : index
    %180 = vector.load %arg14[%c14, %c0_45] : memref<16x32xf32, #tpu.memory_space<vmem>>, vector<2x32xf32>
    tpu.vector_store %arg14[%c14, %c0_45], %179 {strides = array<i32>} : memref<16x32xf32, #tpu.memory_space<vmem>>, vector<2x32xf32>,
    %c0_46 = arith.constant 0 : index
    %c0_47 = arith.constant 0 : index
    %c0_48 = arith.constant 0 : index
    %181 = vector.load %arg12[%c0_46, %c0_47, %c0_48] : memref<2x2x32xf32, #tpu.memory_space<vmem>>, vector<1x2x32xf32>
    %182 = vector.shape_cast %181 : vector<1x2x32xf32> to vector<2x32xf32>
    %183 = vector.shape_cast %179 : vector<2x32xf32> to vector<1x2x32xf32>
    tpu.vector_store %arg12[%c0_46, %c0_47, %c0_48], %183 {strides = array<i32>} : memref<2x2x32xf32, #tpu.memory_space<vmem>>, vector<1x2x32xf32>,
    %c0_49 = arith.constant 0 : index
    %c0_50 = arith.constant 0 : index
    %c0_51 = arith.constant 0 : index
    %184 = vector.load %arg13[%c0_49, %c0_50, %c0_51] : memref<2x2x32xf32, #tpu.memory_space<vmem>>, vector<1x2x32xf32>
    %185 = vector.shape_cast %184 : vector<1x2x32xf32> to vector<2x32xf32>
    %186 = vector.shape_cast %177 : vector<2x32xf32> to vector<1x2x32xf32>
    tpu.vector_store %arg13[%c0_49, %c0_50, %c0_51], %186 {strides = array<i32>} : memref<2x2x32xf32, #tpu.memory_space<vmem>>, vector<1x2x32xf32>,
    %c0_52 = arith.constant 0 : index
    %c0_53 = arith.constant 0 : index
    %187 = vector.load %arg14[%c0_52, %c0_53] : memref<16x32xf32, #tpu.memory_space<vmem>>, vector<16x32xf32>
    %188 = arith.truncf %187 : vector<16x32xf32> to vector<16x32xbf16>
    %c1 = arith.constant 1 : index
    %c0_54 = arith.constant 0 : index
    %c0_55 = arith.constant 0 : index
    %189 = vector.load %arg6[%c1, %c0_54, %c0_55] : memref<2x32x128xbf16, #tpu.memory_space<vmem>>, vector<1x32x128xbf16>
    %190 = vector.shape_cast %189 : vector<1x32x128xbf16> to vector<32x128xbf16>
    %cst_56 = arith.constant dense<0.000000e+00> : vector<16x128xf32>
    %191 = tpu.matmul %188, %190, %cst_56 {dimension_numbers = #tpu.dot_dimension_numbers<[1], [0], [0], [1], [0, 0, 1, 1], [], []>} : vector<16x32xbf16>, vector<32x128xbf16>, vector<16x128xf32> -> vector<16x128xf32>
    %c1_57 = arith.constant 1 : index
    %c0_58 = arith.constant 0 : index
    %c0_59 = arith.constant 0 : index
    %192 = vector.load %arg8[%c1_57, %c0_58, %c0_59] : memref<2x1x128xf32, #tpu.memory_space<vmem>>, vector<1x1x128xf32>
    %193 = vector.shape_cast %192 : vector<1x1x128xf32> to vector<1x128xf32>
    %194 = vector.broadcast %193 : vector<1x128xf32> to vector<16x128xf32>
    %195 = arith.addf %191, %194 : vector<16x128xf32>
    %c1_60 = arith.constant 1 : index
    %c0_61 = arith.constant 0 : index
    %c0_62 = arith.constant 0 : index
    %196 = vector.load %arg7[%c1_60, %c0_61, %c0_62] : memref<2x32x128xbf16, #tpu.memory_space<vmem>>, vector<1x32x128xbf16>
    %197 = vector.shape_cast %196 : vector<1x32x128xbf16> to vector<32x128xbf16>
    %c1_63 = arith.constant 1 : index
    %c0_64 = arith.constant 0 : index
    %c0_65 = arith.constant 0 : index
    %198 = vector.load %arg2[%c1_63, %c0_64, %c0_65] : memref<2x2x32xf32, #tpu.memory_space<vmem>>, vector<1x2x32xf32>
    %199 = vector.shape_cast %198 : vector<1x2x32xf32> to vector<2x32xf32>
    %c1_66 = arith.constant 1 : index
    %c0_67 = arith.constant 0 : index
    %c0_68 = arith.constant 0 : index
    %200 = vector.load %arg3[%c1_66, %c0_67, %c0_68] : memref<2x2x32xf32, #tpu.memory_space<vmem>>, vector<1x2x32xf32>
    %201 = vector.shape_cast %200 : vector<1x2x32xf32> to vector<2x32xf32>
    %202 = vector.extract_strided_slice %195 {offsets = [0, 0], sizes = [2, 128], strides = [1, 1]} : vector<16x128xf32> to vector<2x128xf32>
    %203 = arith.truncf %199 : vector<2x32xf32> to vector<2x32xbf16>
    %cst_69 = arith.constant dense<0.000000e+00> : vector<2x128xf32>
    %204 = tpu.matmul %203, %197, %cst_69 {dimension_numbers = #tpu.dot_dimension_numbers<[1], [0], [0], [1], [0, 0, 1, 1], [], []>} : vector<2x32xbf16>, vector<32x128xbf16>, vector<2x128xf32> -> vector<2x128xf32>
    %205 = arith.addf %202, %204 : vector<2x128xf32>
    %206 = arith.negf %205 : vector<2x128xf32>
    %207 = math.exp %206 : vector<2x128xf32>
    %cst_70 = arith.constant 1.000000e+00 : f32
    %208 = vector.broadcast %cst_70 : f32 to vector<2x128xf32>
    %209 = arith.addf %208, %207 : vector<2x128xf32>
    %210 = arith.divf %208, %209 : vector<2x128xf32>
    %211 = math.tanh %205 : vector<2x128xf32>
    %212 = vector.extract_strided_slice %210 {offsets = [0, 0], sizes = [2, 32], strides = [1, 1]} : vector<2x128xf32> to vector<2x32xf32>
    %213 = vector.extract_strided_slice %210 {offsets = [0, 32], sizes = [2, 32], strides = [1, 1]} : vector<2x128xf32> to vector<2x32xf32>
    %214 = vector.extract_strided_slice %211 {offsets = [0, 64], sizes = [2, 32], strides = [1, 1]} : vector<2x128xf32> to vector<2x32xf32>
    %215 = vector.extract_strided_slice %210 {offsets = [0, 96], sizes = [2, 32], strides = [1, 1]} : vector<2x128xf32> to vector<2x32xf32>
    %216 = arith.mulf %213, %201 : vector<2x32xf32>
    %217 = arith.mulf %212, %214 : vector<2x32xf32>
    %218 = arith.addf %216, %217 : vector<2x32xf32>
    %219 = math.tanh %218 : vector<2x32xf32>
    %220 = arith.mulf %215, %219 : vector<2x32xf32>
    %c0_71 = arith.constant 0 : index
    %c0_72 = arith.constant 0 : index
    %221 = vector.load %arg14[%c0_71, %c0_72] : memref<16x32xf32, #tpu.memory_space<vmem>>, vector<2x32xf32>
    tpu.vector_store %arg14[%c0_71, %c0_72], %220 {strides = array<i32>} : memref<16x32xf32, #tpu.memory_space<vmem>>, vector<2x32xf32>,
    %222 = vector.extract_strided_slice %195 {offsets = [2, 0], sizes = [2, 128], strides = [1, 1]} : vector<16x128xf32> to vector<2x128xf32>
    %223 = arith.truncf %220 : vector<2x32xf32> to vector<2x32xbf16>
    %cst_73 = arith.constant dense<0.000000e+00> : vector<2x128xf32>
    %224 = tpu.matmul %223, %197, %cst_73 {dimension_numbers = #tpu.dot_dimension_numbers<[1], [0], [0], [1], [0, 0, 1, 1], [], []>} : vector<2x32xbf16>, vector<32x128xbf16>, vector<2x128xf32> -> vector<2x128xf32>
    %225 = arith.addf %222, %224 : vector<2x128xf32>
    %226 = arith.negf %225 : vector<2x128xf32>
    %227 = math.exp %226 : vector<2x128xf32>
    %cst_74 = arith.constant 1.000000e+00 : f32
    %228 = vector.broadcast %cst_74 : f32 to vector<2x128xf32>
    %229 = arith.addf %228, %227 : vector<2x128xf32>
    %230 = arith.divf %228, %229 : vector<2x128xf32>
    %231 = math.tanh %225 : vector<2x128xf32>
    %232 = vector.extract_strided_slice %230 {offsets = [0, 0], sizes = [2, 32], strides = [1, 1]} : vector<2x128xf32> to vector<2x32xf32>
    %233 = vector.extract_strided_slice %230 {offsets = [0, 32], sizes = [2, 32], strides = [1, 1]} : vector<2x128xf32> to vector<2x32xf32>
    %234 = vector.extract_strided_slice %231 {offsets = [0, 64], sizes = [2, 32], strides = [1, 1]} : vector<2x128xf32> to vector<2x32xf32>
    %235 = vector.extract_strided_slice %230 {offsets = [0, 96], sizes = [2, 32], strides = [1, 1]} : vector<2x128xf32> to vector<2x32xf32>
    %236 = arith.mulf %233, %218 : vector<2x32xf32>
    %237 = arith.mulf %232, %234 : vector<2x32xf32>
    %238 = arith.addf %236, %237 : vector<2x32xf32>
    %239 = math.tanh %238 : vector<2x32xf32>
    %240 = arith.mulf %235, %239 : vector<2x32xf32>
    %c2_75 = arith.constant 2 : index
    %c0_76 = arith.constant 0 : index
    %241 = vector.load %arg14[%c2_75, %c0_76] : memref<16x32xf32, #tpu.memory_space<vmem>>, vector<2x32xf32>
    tpu.vector_store %arg14[%c2_75, %c0_76], %240 {strides = array<i32>} : memref<16x32xf32, #tpu.memory_space<vmem>>, vector<2x32xf32>,
    %242 = vector.extract_strided_slice %195 {offsets = [4, 0], sizes = [2, 128], strides = [1, 1]} : vector<16x128xf32> to vector<2x128xf32>
    %243 = arith.truncf %240 : vector<2x32xf32> to vector<2x32xbf16>
    %cst_77 = arith.constant dense<0.000000e+00> : vector<2x128xf32>
    %244 = tpu.matmul %243, %197, %cst_77 {dimension_numbers = #tpu.dot_dimension_numbers<[1], [0], [0], [1], [0, 0, 1, 1], [], []>} : vector<2x32xbf16>, vector<32x128xbf16>, vector<2x128xf32> -> vector<2x128xf32>
    %245 = arith.addf %242, %244 : vector<2x128xf32>
    %246 = arith.negf %245 : vector<2x128xf32>
    %247 = math.exp %246 : vector<2x128xf32>
    %cst_78 = arith.constant 1.000000e+00 : f32
    %248 = vector.broadcast %cst_78 : f32 to vector<2x128xf32>
    %249 = arith.addf %248, %247 : vector<2x128xf32>
    %250 = arith.divf %248, %249 : vector<2x128xf32>
    %251 = math.tanh %245 : vector<2x128xf32>
    %252 = vector.extract_strided_slice %250 {offsets = [0, 0], sizes = [2, 32], strides = [1, 1]} : vector<2x128xf32> to vector<2x32xf32>
    %253 = vector.extract_strided_slice %250 {offsets = [0, 32], sizes = [2, 32], strides = [1, 1]} : vector<2x128xf32> to vector<2x32xf32>
    %254 = vector.extract_strided_slice %251 {offsets = [0, 64], sizes = [2, 32], strides = [1, 1]} : vector<2x128xf32> to vector<2x32xf32>
    %255 = vector.extract_strided_slice %250 {offsets = [0, 96], sizes = [2, 32], strides = [1, 1]} : vector<2x128xf32> to vector<2x32xf32>
    %256 = arith.mulf %253, %238 : vector<2x32xf32>
    %257 = arith.mulf %252, %254 : vector<2x32xf32>
    %258 = arith.addf %256, %257 : vector<2x32xf32>
    %259 = math.tanh %258 : vector<2x32xf32>
    %260 = arith.mulf %255, %259 : vector<2x32xf32>
    %c4_79 = arith.constant 4 : index
    %c0_80 = arith.constant 0 : index
    %261 = vector.load %arg14[%c4_79, %c0_80] : memref<16x32xf32, #tpu.memory_space<vmem>>, vector<2x32xf32>
    tpu.vector_store %arg14[%c4_79, %c0_80], %260 {strides = array<i32>} : memref<16x32xf32, #tpu.memory_space<vmem>>, vector<2x32xf32>,
    %262 = vector.extract_strided_slice %195 {offsets = [6, 0], sizes = [2, 128], strides = [1, 1]} : vector<16x128xf32> to vector<2x128xf32>
    %263 = arith.truncf %260 : vector<2x32xf32> to vector<2x32xbf16>
    %cst_81 = arith.constant dense<0.000000e+00> : vector<2x128xf32>
    %264 = tpu.matmul %263, %197, %cst_81 {dimension_numbers = #tpu.dot_dimension_numbers<[1], [0], [0], [1], [0, 0, 1, 1], [], []>} : vector<2x32xbf16>, vector<32x128xbf16>, vector<2x128xf32> -> vector<2x128xf32>
    %265 = arith.addf %262, %264 : vector<2x128xf32>
    %266 = arith.negf %265 : vector<2x128xf32>
    %267 = math.exp %266 : vector<2x128xf32>
    %cst_82 = arith.constant 1.000000e+00 : f32
    %268 = vector.broadcast %cst_82 : f32 to vector<2x128xf32>
    %269 = arith.addf %268, %267 : vector<2x128xf32>
    %270 = arith.divf %268, %269 : vector<2x128xf32>
    %271 = math.tanh %265 : vector<2x128xf32>
    %272 = vector.extract_strided_slice %270 {offsets = [0, 0], sizes = [2, 32], strides = [1, 1]} : vector<2x128xf32> to vector<2x32xf32>
    %273 = vector.extract_strided_slice %270 {offsets = [0, 32], sizes = [2, 32], strides = [1, 1]} : vector<2x128xf32> to vector<2x32xf32>
    %274 = vector.extract_strided_slice %271 {offsets = [0, 64], sizes = [2, 32], strides = [1, 1]} : vector<2x128xf32> to vector<2x32xf32>
    %275 = vector.extract_strided_slice %270 {offsets = [0, 96], sizes = [2, 32], strides = [1, 1]} : vector<2x128xf32> to vector<2x32xf32>
    %276 = arith.mulf %273, %258 : vector<2x32xf32>
    %277 = arith.mulf %272, %274 : vector<2x32xf32>
    %278 = arith.addf %276, %277 : vector<2x32xf32>
    %279 = math.tanh %278 : vector<2x32xf32>
    %280 = arith.mulf %275, %279 : vector<2x32xf32>
    %c6_83 = arith.constant 6 : index
    %c0_84 = arith.constant 0 : index
    %281 = vector.load %arg14[%c6_83, %c0_84] : memref<16x32xf32, #tpu.memory_space<vmem>>, vector<2x32xf32>
    tpu.vector_store %arg14[%c6_83, %c0_84], %280 {strides = array<i32>} : memref<16x32xf32, #tpu.memory_space<vmem>>, vector<2x32xf32>,
    %282 = vector.extract_strided_slice %195 {offsets = [8, 0], sizes = [2, 128], strides = [1, 1]} : vector<16x128xf32> to vector<2x128xf32>
    %283 = arith.truncf %280 : vector<2x32xf32> to vector<2x32xbf16>
    %cst_85 = arith.constant dense<0.000000e+00> : vector<2x128xf32>
    %284 = tpu.matmul %283, %197, %cst_85 {dimension_numbers = #tpu.dot_dimension_numbers<[1], [0], [0], [1], [0, 0, 1, 1], [], []>} : vector<2x32xbf16>, vector<32x128xbf16>, vector<2x128xf32> -> vector<2x128xf32>
    %285 = arith.addf %282, %284 : vector<2x128xf32>
    %286 = arith.negf %285 : vector<2x128xf32>
    %287 = math.exp %286 : vector<2x128xf32>
    %cst_86 = arith.constant 1.000000e+00 : f32
    %288 = vector.broadcast %cst_86 : f32 to vector<2x128xf32>
    %289 = arith.addf %288, %287 : vector<2x128xf32>
    %290 = arith.divf %288, %289 : vector<2x128xf32>
    %291 = math.tanh %285 : vector<2x128xf32>
    %292 = vector.extract_strided_slice %290 {offsets = [0, 0], sizes = [2, 32], strides = [1, 1]} : vector<2x128xf32> to vector<2x32xf32>
    %293 = vector.extract_strided_slice %290 {offsets = [0, 32], sizes = [2, 32], strides = [1, 1]} : vector<2x128xf32> to vector<2x32xf32>
    %294 = vector.extract_strided_slice %291 {offsets = [0, 64], sizes = [2, 32], strides = [1, 1]} : vector<2x128xf32> to vector<2x32xf32>
    %295 = vector.extract_strided_slice %290 {offsets = [0, 96], sizes = [2, 32], strides = [1, 1]} : vector<2x128xf32> to vector<2x32xf32>
    %296 = arith.mulf %293, %278 : vector<2x32xf32>
    %297 = arith.mulf %292, %294 : vector<2x32xf32>
    %298 = arith.addf %296, %297 : vector<2x32xf32>
    %299 = math.tanh %298 : vector<2x32xf32>
    %300 = arith.mulf %295, %299 : vector<2x32xf32>
    %c8_87 = arith.constant 8 : index
    %c0_88 = arith.constant 0 : index
    %301 = vector.load %arg14[%c8_87, %c0_88] : memref<16x32xf32, #tpu.memory_space<vmem>>, vector<2x32xf32>
    tpu.vector_store %arg14[%c8_87, %c0_88], %300 {strides = array<i32>} : memref<16x32xf32, #tpu.memory_space<vmem>>, vector<2x32xf32>,
    %302 = vector.extract_strided_slice %195 {offsets = [10, 0], sizes = [2, 128], strides = [1, 1]} : vector<16x128xf32> to vector<2x128xf32>
    %303 = arith.truncf %300 : vector<2x32xf32> to vector<2x32xbf16>
    %cst_89 = arith.constant dense<0.000000e+00> : vector<2x128xf32>
    %304 = tpu.matmul %303, %197, %cst_89 {dimension_numbers = #tpu.dot_dimension_numbers<[1], [0], [0], [1], [0, 0, 1, 1], [], []>} : vector<2x32xbf16>, vector<32x128xbf16>, vector<2x128xf32> -> vector<2x128xf32>
    %305 = arith.addf %302, %304 : vector<2x128xf32>
    %306 = arith.negf %305 : vector<2x128xf32>
    %307 = math.exp %306 : vector<2x128xf32>
    %cst_90 = arith.constant 1.000000e+00 : f32
    %308 = vector.broadcast %cst_90 : f32 to vector<2x128xf32>
    %309 = arith.addf %308, %307 : vector<2x128xf32>
    %310 = arith.divf %308, %309 : vector<2x128xf32>
    %311 = math.tanh %305 : vector<2x128xf32>
    %312 = vector.extract_strided_slice %310 {offsets = [0, 0], sizes = [2, 32], strides = [1, 1]} : vector<2x128xf32> to vector<2x32xf32>
    %313 = vector.extract_strided_slice %310 {offsets = [0, 32], sizes = [2, 32], strides = [1, 1]} : vector<2x128xf32> to vector<2x32xf32>
    %314 = vector.extract_strided_slice %311 {offsets = [0, 64], sizes = [2, 32], strides = [1, 1]} : vector<2x128xf32> to vector<2x32xf32>
    %315 = vector.extract_strided_slice %310 {offsets = [0, 96], sizes = [2, 32], strides = [1, 1]} : vector<2x128xf32> to vector<2x32xf32>
    %316 = arith.mulf %313, %298 : vector<2x32xf32>
    %317 = arith.mulf %312, %314 : vector<2x32xf32>
    %318 = arith.addf %316, %317 : vector<2x32xf32>
    %319 = math.tanh %318 : vector<2x32xf32>
    %320 = arith.mulf %315, %319 : vector<2x32xf32>
    %c10_91 = arith.constant 10 : index
    %c0_92 = arith.constant 0 : index
    %321 = vector.load %arg14[%c10_91, %c0_92] : memref<16x32xf32, #tpu.memory_space<vmem>>, vector<2x32xf32>
    tpu.vector_store %arg14[%c10_91, %c0_92], %320 {strides = array<i32>} : memref<16x32xf32, #tpu.memory_space<vmem>>, vector<2x32xf32>,
    %322 = vector.extract_strided_slice %195 {offsets = [12, 0], sizes = [2, 128], strides = [1, 1]} : vector<16x128xf32> to vector<2x128xf32>
    %323 = arith.truncf %320 : vector<2x32xf32> to vector<2x32xbf16>
    %cst_93 = arith.constant dense<0.000000e+00> : vector<2x128xf32>
    %324 = tpu.matmul %323, %197, %cst_93 {dimension_numbers = #tpu.dot_dimension_numbers<[1], [0], [0], [1], [0, 0, 1, 1], [], []>} : vector<2x32xbf16>, vector<32x128xbf16>, vector<2x128xf32> -> vector<2x128xf32>
    %325 = arith.addf %322, %324 : vector<2x128xf32>
    %326 = arith.negf %325 : vector<2x128xf32>
    %327 = math.exp %326 : vector<2x128xf32>
    %cst_94 = arith.constant 1.000000e+00 : f32
    %328 = vector.broadcast %cst_94 : f32 to vector<2x128xf32>
    %329 = arith.addf %328, %327 : vector<2x128xf32>
    %330 = arith.divf %328, %329 : vector<2x128xf32>
    %331 = math.tanh %325 : vector<2x128xf32>
    %332 = vector.extract_strided_slice %330 {offsets = [0, 0], sizes = [2, 32], strides = [1, 1]} : vector<2x128xf32> to vector<2x32xf32>
    %333 = vector.extract_strided_slice %330 {offsets = [0, 32], sizes = [2, 32], strides = [1, 1]} : vector<2x128xf32> to vector<2x32xf32>
    %334 = vector.extract_strided_slice %331 {offsets = [0, 64], sizes = [2, 32], strides = [1, 1]} : vector<2x128xf32> to vector<2x32xf32>
    %335 = vector.extract_strided_slice %330 {offsets = [0, 96], sizes = [2, 32], strides = [1, 1]} : vector<2x128xf32> to vector<2x32xf32>
    %336 = arith.mulf %333, %318 : vector<2x32xf32>
    %337 = arith.mulf %332, %334 : vector<2x32xf32>
    %338 = arith.addf %336, %337 : vector<2x32xf32>
    %339 = math.tanh %338 : vector<2x32xf32>
    %340 = arith.mulf %335, %339 : vector<2x32xf32>
    %c12_95 = arith.constant 12 : index
    %c0_96 = arith.constant 0 : index
    %341 = vector.load %arg14[%c12_95, %c0_96] : memref<16x32xf32, #tpu.memory_space<vmem>>, vector<2x32xf32>
    tpu.vector_store %arg14[%c12_95, %c0_96], %340 {strides = array<i32>} : memref<16x32xf32, #tpu.memory_space<vmem>>, vector<2x32xf32>,
    %342 = vector.extract_strided_slice %195 {offsets = [14, 0], sizes = [2, 128], strides = [1, 1]} : vector<16x128xf32> to vector<2x128xf32>
    %343 = arith.truncf %340 : vector<2x32xf32> to vector<2x32xbf16>
    %cst_97 = arith.constant dense<0.000000e+00> : vector<2x128xf32>
    %344 = tpu.matmul %343, %197, %cst_97 {dimension_numbers = #tpu.dot_dimension_numbers<[1], [0], [0], [1], [0, 0, 1, 1], [], []>} : vector<2x32xbf16>, vector<32x128xbf16>, vector<2x128xf32> -> vector<2x128xf32>
    %345 = arith.addf %342, %344 : vector<2x128xf32>
    %346 = arith.negf %345 : vector<2x128xf32>
    %347 = math.exp %346 : vector<2x128xf32>
    %cst_98 = arith.constant 1.000000e+00 : f32
    %348 = vector.broadcast %cst_98 : f32 to vector<2x128xf32>
    %349 = arith.addf %348, %347 : vector<2x128xf32>
    %350 = arith.divf %348, %349 : vector<2x128xf32>
    %351 = math.tanh %345 : vector<2x128xf32>
    %352 = vector.extract_strided_slice %350 {offsets = [0, 0], sizes = [2, 32], strides = [1, 1]} : vector<2x128xf32> to vector<2x32xf32>
    %353 = vector.extract_strided_slice %350 {offsets = [0, 32], sizes = [2, 32], strides = [1, 1]} : vector<2x128xf32> to vector<2x32xf32>
    %354 = vector.extract_strided_slice %351 {offsets = [0, 64], sizes = [2, 32], strides = [1, 1]} : vector<2x128xf32> to vector<2x32xf32>
    %355 = vector.extract_strided_slice %350 {offsets = [0, 96], sizes = [2, 32], strides = [1, 1]} : vector<2x128xf32> to vector<2x32xf32>
    %356 = arith.mulf %353, %338 : vector<2x32xf32>
    %357 = arith.mulf %352, %354 : vector<2x32xf32>
    %358 = arith.addf %356, %357 : vector<2x32xf32>
    %359 = math.tanh %358 : vector<2x32xf32>
    %360 = arith.mulf %355, %359 : vector<2x32xf32>
    %c14_99 = arith.constant 14 : index
    %c0_100 = arith.constant 0 : index
    %361 = vector.load %arg14[%c14_99, %c0_100] : memref<16x32xf32, #tpu.memory_space<vmem>>, vector<2x32xf32>
    tpu.vector_store %arg14[%c14_99, %c0_100], %360 {strides = array<i32>} : memref<16x32xf32, #tpu.memory_space<vmem>>, vector<2x32xf32>,
    %c1_101 = arith.constant 1 : index
    %c0_102 = arith.constant 0 : index
    %c0_103 = arith.constant 0 : index
    %362 = vector.load %arg12[%c1_101, %c0_102, %c0_103] : memref<2x2x32xf32, #tpu.memory_space<vmem>>, vector<1x2x32xf32>
    %363 = vector.shape_cast %362 : vector<1x2x32xf32> to vector<2x32xf32>
    %364 = vector.shape_cast %360 : vector<2x32xf32> to vector<1x2x32xf32>
    tpu.vector_store %arg12[%c1_101, %c0_102, %c0_103], %364 {strides = array<i32>} : memref<2x2x32xf32, #tpu.memory_space<vmem>>, vector<1x2x32xf32>,
    %c1_104 = arith.constant 1 : index
    %c0_105 = arith.constant 0 : index
    %c0_106 = arith.constant 0 : index
    %365 = vector.load %arg13[%c1_104, %c0_105, %c0_106] : memref<2x2x32xf32, #tpu.memory_space<vmem>>, vector<1x2x32xf32>
    %366 = vector.shape_cast %365 : vector<1x2x32xf32> to vector<2x32xf32>
    %367 = vector.shape_cast %358 : vector<2x32xf32> to vector<1x2x32xf32>
    tpu.vector_store %arg13[%c1_104, %c0_105, %c0_106], %367 {strides = array<i32>} : memref<2x2x32xf32, #tpu.memory_space<vmem>>, vector<1x2x32xf32>,
    %c0_107 = arith.constant 0 : index
    %c0_108 = arith.constant 0 : index
    %368 = vector.load %arg14[%c0_107, %c0_108] : memref<16x32xf32, #tpu.memory_space<vmem>>, vector<16x32xf32>
    %369 = arith.truncf %368 : vector<16x32xf32> to vector<16x32xbf16>
    %c0_109 = arith.constant 0 : index
    %c0_110 = arith.constant 0 : index
    %370 = vector.load %arg9[%c0_109, %c0_110] : memref<32x4xbf16, #tpu.memory_space<vmem>>, vector<32x4xbf16>
    %cst_111 = arith.constant dense<0.000000e+00> : vector<16x4xf32>
    %371 = tpu.matmul %369, %370, %cst_111 {dimension_numbers = #tpu.dot_dimension_numbers<[1], [0], [0], [1], [0, 0, 1, 1], [], []>} : vector<16x32xbf16>, vector<32x4xbf16>, vector<16x4xf32> -> vector<16x4xf32>
    %c0_112 = arith.constant 0 : index
    %c0_113 = arith.constant 0 : index
    %372 = vector.load %arg10[%c0_112, %c0_113] : memref<1x4xf32, #tpu.memory_space<vmem>>, vector<1x4xf32>
    %373 = vector.broadcast %372 : vector<1x4xf32> to vector<16x4xf32>
    %374 = arith.addf %371, %373 : vector<16x4xf32>
    %c0_114 = arith.constant 0 : index
    %c0_115 = arith.constant 0 : index
    %375 = vector.load %arg11[%c0_114, %c0_115] : memref<16x4xf32, #tpu.memory_space<vmem>>, vector<16x4xf32>
    tpu.vector_store %arg11[%c0_114, %c0_115], %374 {strides = array<i32>} : memref<16x4xf32, #tpu.memory_space<vmem>>, vector<16x4xf32>,
    return
  }
  func.func @transform_0(%arg0: i32) -> (i32, i32) {
    %c0_i32 = arith.constant 0 : i32
    %c0_i32_0 = arith.constant 0 : i32
    %c0_i32_1 = arith.constant 0 : i32
    return %c0_i32, %c0_i32_0 : i32, i32
  }
  func.func @transform_1(%arg0: i32) -> (i32, i32, i32) {
    %c0_i32 = arith.constant 0 : i32
    %c0_i32_0 = arith.constant 0 : i32
    %c0_i32_1 = arith.constant 0 : i32
    %c0_i32_2 = arith.constant 0 : i32
    return %c0_i32, %c0_i32_0, %c0_i32_1 : i32, i32, i32
  }
  func.func @transform_2(%arg0: i32) -> (i32, i32, i32) {
    %c0_i32 = arith.constant 0 : i32
    %c0_i32_0 = arith.constant 0 : i32
    %c0_i32_1 = arith.constant 0 : i32
    %c0_i32_2 = arith.constant 0 : i32
    return %c0_i32, %c0_i32_0, %c0_i32_1 : i32, i32, i32
  }
  func.func @transform_3(%arg0: i32) -> (i32, i32) {
    %c0_i32 = arith.constant 0 : i32
    %c0_i32_0 = arith.constant 0 : i32
    %c0_i32_1 = arith.constant 0 : i32
    return %c0_i32, %c0_i32_0 : i32, i32
  }
  func.func @transform_4(%arg0: i32) -> (i32, i32) {
    %c0_i32 = arith.constant 0 : i32
    %c0_i32_0 = arith.constant 0 : i32
    %c0_i32_1 = arith.constant 0 : i32
    return %c0_i32, %c0_i32_0 : i32, i32
  }
  func.func @transform_5(%arg0: i32) -> (i32, i32, i32) {
    %c0_i32 = arith.constant 0 : i32
    %c0_i32_0 = arith.constant 0 : i32
    %c0_i32_1 = arith.constant 0 : i32
    %c0_i32_2 = arith.constant 0 : i32
    return %c0_i32, %c0_i32_0, %c0_i32_1 : i32, i32, i32
  }
  func.func @transform_6(%arg0: i32) -> (i32, i32, i32) {
    %c0_i32 = arith.constant 0 : i32
    %c0_i32_0 = arith.constant 0 : i32
    %c0_i32_1 = arith.constant 0 : i32
    %c0_i32_2 = arith.constant 0 : i32
    return %c0_i32, %c0_i32_0, %c0_i32_1 : i32, i32, i32
  }
  func.func @transform_7(%arg0: i32) -> (i32, i32, i32) {
    %c0_i32 = arith.constant 0 : i32
    %c0_i32_0 = arith.constant 0 : i32
    %c0_i32_1 = arith.constant 0 : i32
    %c0_i32_2 = arith.constant 0 : i32
    return %c0_i32, %c0_i32_0, %c0_i32_1 : i32, i32, i32
  }
  func.func @transform_8(%arg0: i32) -> (i32, i32) {
    %c0_i32 = arith.constant 0 : i32
    %c0_i32_0 = arith.constant 0 : i32
    %c0_i32_1 = arith.constant 0 : i32
    return %c0_i32, %c0_i32_0 : i32, i32
  }
  func.func @transform_9(%arg0: i32) -> (i32, i32) {
    %c0_i32 = arith.constant 0 : i32
    %c0_i32_0 = arith.constant 0 : i32
    %c0_i32_1 = arith.constant 0 : i32
    return %c0_i32, %c0_i32_0 : i32, i32
  }
  func.func @transform_10(%arg0: i32) -> (i32, i32) {
    %c0_i32 = arith.constant 0 : i32
    %c0_i32_0 = arith.constant 0 : i32
    %c0_i32_1 = arith.constant 0 : i32
    return %c0_i32, %c0_i32_0 : i32, i32
  }
  func.func @transform_11(%arg0: i32) -> (i32, i32, i32) {
    %c0_i32 = arith.constant 0 : i32
    %c0_i32_0 = arith.constant 0 : i32
    %c0_i32_1 = arith.constant 0 : i32
    %c0_i32_2 = arith.constant 0 : i32
    return %c0_i32, %c0_i32_0, %c0_i32_1 : i32, i32, i32
  }
  func.func @transform_12(%arg0: i32) -> (i32, i32, i32) {
    %c0_i32 = arith.constant 0 : i32
    %c0_i32_0 = arith.constant 0 : i32
    %c0_i32_1 = arith.constant 0 : i32
    %c0_i32_2 = arith.constant 0 : i32
    return %c0_i32, %c0_i32_0, %c0_i32_1 : i32, i32, i32
  }
}

</mosaic_0001>

<bundles_post_ra>
// kernel: tpu_custom_call.1
= control target key start
LH: loop header
LB: loop body
LE: loop exit
PB: predicated region body
PF: predicated region fallthrough
CT: control target
= control target key end

     0   :  { %18 = vsyncpa [#allocation4], 0  ;;  %s2743_s0 = inlined_call_operand.vmem [shape: f32[16,4], index: 0, kind: input, shape index: {}]   ;;  %s2744_s1 = inlined_call_operand.vmem [shape: f32[2,2,32], index: 1, kind: input, shape index: {}]   ;;  %s2745_s2 = inlined_call_operand.vmem [shape: f32[2,2,32], index: 2, kind: input, shape index: {}]   ;;  %s2746_s3 = inlined_call_operand.vmem [shape: bf16[4,32], index: 3, kind: input, shape index: {}]   ;;  %s2747_s4 = inlined_call_operand.vmem [shape: f32[1,32], index: 4, kind: input, shape index: {}]   ;;  %s2748_s5 = inlined_call_operand.vmem [shape: bf16[2,32,128], index: 5, kind: input, shape index: {}]   ;;  %s2749_s6 = inlined_call_operand.hbm [shape: bf16[2,32,128], index: 6, kind: input, shape index: {}]   ;;  %s2750_s7 = inlined_call_operand.vmem [shape: f32[2,1,128], index: 7, kind: input, shape index: {}]   ;;  %s2751_s8 = inlined_call_operand.vmem [shape: bf16[32,4], index: 8, kind: input, shape index: {}]   ;;  %s2752_s9 = inlined_call_operand.vmem [shape: f32[1,4], index: 9, kind: input, shape index: {}]   ;;  %s2753_s10 = inlined_call_operand.vmem [shape: f32[16,4], index: 10, kind: output, shape index: {0}]   ;;  %s2754_s11 = inlined_call_operand.hbm [shape: f32[2,2,32], index: 11, kind: output, shape index: {1}]   ;;  %s2755_s12 = inlined_call_operand.hbm [shape: f32[2,2,32], index: 12, kind: output, shape index: {2}]  }
   0x1   :  { %19 = vsyncpa [#allocation5], 0 }
   0x2   :  { %20 = vsyncpa [#allocation8], 0  ;;  %s2238_s21 = smov [#allocation3]   ;;  %s2166_s25 = scalar_lea.hbm %s2749_s6, 512 }
   0x3   :  { %s38_s22 = sshll.u32 %s2238_s21, 4  ;;  %p2167_p0 = scmp.ne.s32.totalorder %s2749_s6, %s2166_s25  ;;  %s39_s22 = int_to_ptr.vmem [resolvable:$true] %s38_s22 }
   0x4   :  { %p2170_p1 = scmp.lt.u32.totalorder %s2166_s25, %s2749_s6 }
   0x6   :  { %p2172_p2 = pnand %p2170_p1, %p2167_p0 }
   0x8   :  { %2175 = shalt.err (!%p2172_p2)
}
   0x9   :  { %s2176_s30 = scalar_lea.vmem %s39_s22, 512  ;;  %p2181_p4 = scmp.lt.s32.totalorder %s39_s22, %s39_s22 }
   0xa   :  { %p2177_p3 = scmp.ne.s32.totalorder %s39_s22, %s2176_s30  ;;  %p2182_p5 = scmp.lt.s32.totalorder %s2176_s30, %s2176_s30 }
   0xc   :  { %p2183_p6 = por %p2182_p5, %p2181_p4 }
   0xe   :  { %p2184_p7 = pnand %p2183_p6, %p2177_p3 }
  0x10   :  { %2187 = shalt.err (!%p2184_p7)
}
  0x11   :  { %s2239_s13 = smov 64   ;;  %s2240_s14 = smov 4  }
  0x12   :  { %44 = dma.hbm_to_vmem [thread:$0]  %s2749_s6, 512, %s39_s22, [#allocation4], %s2239_s13, %s2239_s13, %s2240_s14  }
  0x13   :  { %2232 = dma.done.wait [#allocation4], 512  }
  0x14   :  { %2233 = vsyncadd [#allocation4], 4294966784  ;;  %v2241_v0 = vmov 0.0   ;;  %vm2242_vm0 = vmmov 0   ;;  %vm70_vm1 = vcmask 1041408   ;;  %v55_v2 = vld [vmem:[%s2743_s0] sm:$0xff] }
  0x15   :  { %1860 = vmatprep.subr.bf16.mxu0 %v2241_v0  ;;  %1862 = vmatprep.mubr.msk.bf16.mxu0 %vm2242_vm0, %v2241_v0  ;;  %v58_v1 = vld [vmem:[%s2746_s3] sm:$0x3]  ;;  %v56_v3 = vld [vmem:[%s2743_s0 + $0x8] sm:$0xff]  ;;  %vm66_vm2 = vcmask 31744   ;;  %v2342_v6 = vld [vmem:[#allocation3] sm:$0xff]   ;;  %vm139_vm3 = vcmask 261120  }
  0x16   :  { %1866 = vmatprep.subr.bf16.mxu1 %v2241_v0  ;;  %1870 = vmatprep.mubr.msk.bf16.mxu1 %vm2242_vm0, %v2241_v0  ;;  %v72_v4 = vsel %vm70_vm1, %v58_v1, 0  ;;  %v57_v5 = vpack.c.bf16 %v56_v3, %v55_v2  ;;  %v2029_v7 = vld [vmem:[%s2748_s5] sm:$0xff]   ;;  %v2354_v8 = vld [vmem:[#allocation3 + $0x8] sm:$0xff]   ;;  %v2031_v9 = vld [vmem:[%s2748_s5 + $0x8] sm:$0xff]   ;;  %s2243_s14 = smov 32   ;;  %vm279_vm4 = vcmask 254976  }
  0x17   :  { %1861 = vmatpush3.bf16.msra.mxu0 %v72_v4  ;;  %1867 = vmatpush3.bf16.msra.mxu1 %v2029_v7  ;;  %v188_v10 = vld [vmem:[%s2744_s1] sm:$0x3]  ;;  %vm448_vm5 = vcmask 259076   ;;  %vm363_vm6 = vcmask 257026   ;;  %vm533_vm7 = vcmask 261126   ;;  %s2246_s23 = smov [#allocation7]  }
  0x18   :  { %1874 = vmatprep.subr.bf16.mxu0 %v2241_v0  ;;  %1868 = vmatprep.subr.bf16.mxu1 %v2241_v0  ;;  %v190_v11 = vpack.c.bf16 %v188_v10, %v188_v10  ;;  %v1744_v12 = vld [vmem:[%s2747_s4] ss:$0 sm:$0xff]  ;;  %s1726_s24 = sshll.u32 %s2246_s23, 4  ;;  %s1727_s24 = int_to_ptr.vmem [resolvable:$true] %s1726_s24 }
  0x19   :  { %v1746_v24 = vld [vmem:[%s2750_s7] ss:$0 sm:$0xff] }
  0x1a   :  { %1863 = vmatmul.mubr.msk.bf16.vlgmr.msra.gmra.mrb[0].mxu0 %vm66_vm2, %v57_v5  ;;  %v189_v33 = vld [vmem:[%s2745_s2] sm:$0x3] }
  0x1b   :  { %1875 = vmatpush3.bf16.msra.mxu0 %v2342_v6  ;;  %1878 = vmatprep.mubr.msk.bf16.mxu0 %vm2242_vm0, %v2241_v0 }
  0x1c   :  { %1876 = vmatprep.subr.bf16.mxu0 %v2241_v0  ;;  %1869 = vmatpush3.bf16.msra.mxu1 %v2031_v9 }
  0x1d   :  { %1882 = vmatprep.subr.bf16.mxu1 %v2241_v0 }
  0x1f   :  { %1877 = vmatpush3.bf16.msra.mxu0 %v2354_v8 }
  0x20   :  { %1890 = vmatprep.subr.bf16.mxu0 %v2241_v0 }
  0x22   :  { %1879 = vmatmul.mubr.msk.bf16.vlgmr.msra.gmra.mrb[4].mxu0 %vm139_vm3, %v190_v11 }
  0x23   :  { %1891 = vmatpush3.bf16.msra.mxu0 %v2342_v6  ;;  %1894 = vmatprep.mubr.msk.bf16.mxu0 %vm2242_vm0, %v2241_v0 }
  0x24   :  { %1892 = vmatprep.subr.bf16.mxu0 %v2241_v0 }
  0x27   :  { %1893 = vmatpush3.bf16.msra.mxu0 %v2354_v8 }
  0x28   :  { %1906 = vmatprep.subr.bf16.mxu0 %v2241_v0 }
  0xed   :  { %v108_v13 = vpop.f32.mrb[0].mxu0 }
  0xee   :  { %v1864_v14 = vpop.f32.mrb[1].mxu0  ;;  %v109_v16 = vadd.f32 %v1744_v12, %v108_v13 }
  0xef   :  { %v111_v15 = vpop.f32.mrb[2].mxu0 }
  0xf0   :  { %v112_v17 = vadd.f32 %v1744_v12, %v111_v15  ;;  %v1865_v18 = vpop.f32.mrb[3].mxu0 }
  0xf2   :  { %v115_v19 = vpack.c.bf16 %v112_v17, %v109_v16 }
  0xf4   :  { %1871 = vmatmul.mubr.msk.bf16.vlgmr.msra.gmra.mrb[0].mxu1 %vm139_vm3, %v115_v19 }
  0xf5   :  { %1883 = vmatpush3.bf16.msra.mxu1 %v2342_v6  ;;  %1886 = vmatprep.mubr.msk.bf16.mxu1 %vm2242_vm0, %v2241_v0  ;;  %v240_v20 = vpop.f32.mrb[4].mxu0 }
  0xf6   :  { %1884 = vmatprep.subr.bf16.mxu1 %v2241_v0  ;;  %v1880_v21 = vpop.f32.mrb[5].mxu0 }
  0xf7   :  { %v243_v22 = vpop.f32.mrb[6].mxu0 }
  0xf8   :  { %v1881_v23 = vpop.f32.mrb[7].mxu0 }
  0xf9   :  { %1885 = vmatpush3.bf16.msra.mxu1 %v2354_v8 }
  0xfa   :  { %1898 = vmatprep.subr.bf16.mxu1 %v2241_v0 }
 0x1c7   :  { %v177_v25 = vpop.f32.mrb[0].mxu1 }
 0x1c8   :  { %v2385_v26 = vadd.f32 %v1746_v24, %v177_v25  ;;  %v1872_v27 = vpop.f32.mrb[1].mxu1 }
 0x1c9   :  { %v180_v28 = vpop.f32.mrb[2].mxu1 }
 0x1ca   :  { %v2387_v29 = vadd.f32 %v1746_v24, %v180_v28  ;;  %v1873_v30 = vpop.f32.mrb[3].mxu1  ;;  %v246_v31 = vadd.f32 %v240_v20, %v2385_v26 }
 0x1cc   :  { %2038 = vtanh.f32 %v246_v31  ;;  %v1753_v34 = vmul.f32 -1.442695, %v246_v31 }
 0x1ce   :  { %2040 = vpow2.f32 %v1753_v34 }
 0x1d6   :  { %v2039_v32 = vpop.eup %2038 }
 0x1d7   :  { %260 = vrot.lane.b32.xlu0 %v2039_v32, %s2239_s13 }
 0x1d8   :  { %v2041_v35 = vpop.eup %2040 }
 0x1d9   :  { %v250_v36 = vadd.f32 1.0, %v2041_v35 }
 0x1db   :  { %255 = vrot.lane.b32.xlu0 %v189_v33, %s2243_s14  ;;  %2042 = vrcp.f32 %v250_v36 }
 0x1e5   :  { %v2043_v37 = vpop.eup %2042 }
 0x249   :  { %v261_v38 = vpop.permute.xlu0 %260 }
 0x24a   :  { %v263_v39 = vmul.f32 %v2043_v37, %v261_v38 }
 0x24c   :  { %265 = vrot.lane.b32.xlu1 %v263_v39, %s2243_s14 }
 0x24d   :  { %v256_v40 = vpop.permute.xlu0 %255 }
 0x24e   :  { %v258_v41 = vmul.f32 %v2043_v37, %v256_v40 }
 0x2be   :  { %v266_v42 = vpop.permute.xlu1 %265 }
 0x2bf   :  { %v268_v43 = vadd.f32 %v266_v42, %v258_v41 }
 0x2c1   :  { %2044 = vtanh.f32 %v268_v43  ;;  %v340_v62 = vrot.slane %v268_v43, 6 }
 0x2cb   :  { %v2045_v44 = vpop.eup %2044 }
 0x2cc   :  { %271 = vrot.lane.b32.xlu1 %v2045_v44, %s2239_s13 }
 0x33e   :  { %v272_v45 = vpop.permute.xlu1 %271 }
 0x33f   :  { %v2397_v46 = vmul.f32 %v2043_v37, %v272_v45 }
 0x341   :  { %v281_v47 = vpack.c.bf16 %v2397_v46, %v2397_v46 }
 0x343   :  { %283 = vrot.lane.b32.xlu0 %v281_v47, %s2243_s14 }
 0x3b5   :  { %v284_v48 = vpop.permute.xlu0 %283 }
 0x3b6   :  { %1887 = vmatmul.mubr.msk.bf16.vlgmr.msra.gmra.mrb[4].mxu1 %vm139_vm3, %v284_v48 }
 0x3b7   :  { %1899 = vmatpush3.bf16.msra.mxu1 %v2342_v6  ;;  %1902 = vmatprep.mubr.msk.bf16.mxu1 %vm2242_vm0, %v2241_v0 }
 0x3b8   :  { %1900 = vmatprep.subr.bf16.mxu1 %v2241_v0 }
 0x3bb   :  { %1901 = vmatpush3.bf16.msra.mxu1 %v2354_v8 }
 0x3bc   :  { %1914 = vmatprep.subr.bf16.mxu1 %v2241_v0 }
 0x489   :  { %v322_v49 = vpop.f32.mrb[4].mxu1 }
 0x48a   :  { %v329_v50 = vrot.slane %v322_v49, 6  ;;  %v1888_v51 = vpop.f32.mrb[5].mxu1 }
 0x48b   :  { %v325_v52 = vpop.f32.mrb[6].mxu1 }
 0x48c   :  { %v331_v53 = vadd.f32 %v329_v50, %v2385_v26  ;;  %v1889_v54 = vpop.f32.mrb[7].mxu1 }
 0x48e   :  { %2046 = vtanh.f32 %v331_v53  ;;  %v1755_v56 = vmul.f32 -1.442695, %v331_v53 }
 0x490   :  { %2048 = vpow2.f32 %v1755_v56 }
 0x498   :  { %v2047_v55 = vpop.eup %2046 }
 0x499   :  { %344 = vrot.lane.b32.xlu1 %v2047_v55, %s2239_s13 }
 0x49a   :  { %v2049_v57 = vpop.eup %2048 }
 0x49b   :  { %v335_v58 = vadd.f32 1.0, %v2049_v57 }
 0x49d   :  { %2050 = vrcp.f32 %v335_v58 }
 0x4a7   :  { %v2051_v59 = vpop.eup %2050 }
 0x4a8   :  { %v342_v63 = vmul.f32 %v2051_v59, %v340_v62 }
 0x50b   :  { %v345_v60 = vpop.permute.xlu1 %344 }
 0x50c   :  { %v347_v61 = vmul.f32 %v2051_v59, %v345_v60 }
 0x50e   :  { %349 = vrot.lane.b32.xlu0 %v347_v61, %s2243_s14 }
 0x580   :  { %v350_v1 = vpop.permute.xlu0 %349 }
 0x581   :  { %v352_v2 = vadd.f32 %v350_v1, %v342_v63 }
 0x583   :  { %2052 = vtanh.f32 %v352_v2  ;;  %v425_v24 = vrot.slane %v352_v2, 6 }
 0x58d   :  { %v2053_v3 = vpop.eup %2052 }
 0x58e   :  { %355 = vrot.lane.b32.xlu1 %v2053_v3, %s2239_s13 }
 0x600   :  { %v356_v4 = vpop.permute.xlu1 %355 }
 0x601   :  { %v2413_v5 = vmul.f32 %v2051_v59, %v356_v4 }
 0x603   :  { %v365_v7 = vpack.c.bf16 %v2413_v5, %v2413_v5 }
 0x605   :  { %v367_v9 = vrot.slane %v365_v7, 1 }
 0x607   :  { %368 = vrot.lane.b32.xlu0 %v367_v9, %s2243_s14 }
 0x679   :  { %v369_v10 = vpop.permute.xlu0 %368 }
 0x67a   :  { %1895 = vmatmul.mubr.msk.bf16.vlgmr.msra.gmra.mrb[8].mxu0 %vm139_vm3, %v369_v10 }
 0x67b   :  { %1907 = vmatpush3.bf16.msra.mxu0 %v2342_v6  ;;  %1910 = vmatprep.mubr.msk.bf16.mxu0 %vm2242_vm0, %v2241_v0 }
 0x67c   :  { %1908 = vmatprep.subr.bf16.mxu0 %v2241_v0 }
 0x67f   :  { %1909 = vmatpush3.bf16.msra.mxu0 %v2354_v8 }
 0x680   :  { %1922 = vmatprep.subr.bf16.mxu0 %v2241_v0 }
 0x74d   :  { %v407_v11 = vpop.f32.mrb[8].mxu0 }
 0x74e   :  { %v414_v12 = vrot.slane %v407_v11, 4  ;;  %v1896_v13 = vpop.f32.mrb[9].mxu0 }
 0x74f   :  { %v410_v14 = vpop.f32.mrb[10].mxu0 }
 0x750   :  { %v416_v15 = vadd.f32 %v414_v12, %v2385_v26  ;;  %v1897_v16 = vpop.f32.mrb[11].mxu0 }
 0x752   :  { %2054 = vtanh.f32 %v416_v15  ;;  %v1757_v18 = vmul.f32 -1.442695, %v416_v15 }
 0x754   :  { %2056 = vpow2.f32 %v1757_v18 }
 0x75c   :  { %v2055_v17 = vpop.eup %2054 }
 0x75d   :  { %429 = vrot.lane.b32.xlu1 %v2055_v17, %s2239_s13 }
 0x75e   :  { %v2057_v19 = vpop.eup %2056 }
 0x75f   :  { %v420_v20 = vadd.f32 1.0, %v2057_v19 }
 0x761   :  { %2058 = vrcp.f32 %v420_v20 }
 0x76b   :  { %v2059_v21 = vpop.eup %2058 }
 0x76c   :  { %v427_v25 = vmul.f32 %v2059_v21, %v425_v24 }
 0x7cf   :  { %v430_v22 = vpop.permute.xlu1 %429 }
 0x7d0   :  { %v432_v23 = vmul.f32 %v2059_v21, %v430_v22 }
 0x7d2   :  { %434 = vrot.lane.b32.xlu0 %v432_v23, %s2243_s14 }
 0x844   :  { %v435_v27 = vpop.permute.xlu0 %434 }
 0x845   :  { %v437_v28 = vadd.f32 %v435_v27, %v427_v25 }
 0x847   :  { %2060 = vtanh.f32 %v437_v28  ;;  %v510_v50 = vrot.slane %v437_v28, 6 }
 0x851   :  { %v2061_v30 = vpop.eup %2060 }
 0x852   :  { %440 = vrot.lane.b32.xlu1 %v2061_v30, %s2239_s13 }
 0x8c4   :  { %v441_v31 = vpop.permute.xlu1 %440 }
 0x8c5   :  { %v2429_v32 = vmul.f32 %v2059_v21, %v441_v31 }
 0x8c7   :  { %v450_v33 = vpack.c.bf16 %v2429_v32, %v2429_v32 }
 0x8c9   :  { %v452_v34 = vrot.slane %v450_v33, 2 }
 0x8cb   :  { %453 = vrot.lane.b32.xlu0 %v452_v34, %s2243_s14 }
 0x93d   :  { %v454_v35 = vpop.permute.xlu0 %453 }
 0x93e   :  { %1903 = vmatmul.mubr.msk.bf16.vlgmr.msra.gmra.mrb[8].mxu1 %vm139_vm3, %v454_v35 }
 0x93f   :  { %1915 = vmatpush3.bf16.msra.mxu1 %v2342_v6  ;;  %1918 = vmatprep.mubr.msk.bf16.mxu1 %vm2242_vm0, %v2241_v0 }
 0x940   :  { %1916 = vmatprep.subr.bf16.mxu1 %v2241_v0 }
 0x943   :  { %1917 = vmatpush3.bf16.msra.mxu1 %v2354_v8 }
 0x944   :  { %1930 = vmatprep.subr.bf16.mxu1 %v2241_v0 }
 0xa11   :  { %v492_v36 = vpop.f32.mrb[8].mxu1 }
 0xa12   :  { %v499_v37 = vrot.slane %v492_v36, 2  ;;  %v1904_v38 = vpop.f32.mrb[9].mxu1 }
 0xa13   :  { %v495_v39 = vpop.f32.mrb[10].mxu1 }
 0xa14   :  { %v501_v40 = vadd.f32 %v499_v37, %v2385_v26  ;;  %v1905_v41 = vpop.f32.mrb[11].mxu1 }
 0xa16   :  { %2062 = vtanh.f32 %v501_v40  ;;  %v1759_v43 = vmul.f32 -1.442695, %v501_v40 }
 0xa18   :  { %2064 = vpow2.f32 %v1759_v43 }
 0xa20   :  { %v2063_v42 = vpop.eup %2062 }
 0xa21   :  { %514 = vrot.lane.b32.xlu1 %v2063_v42, %s2239_s13 }
 0xa22   :  { %v2065_v44 = vpop.eup %2064 }
 0xa23   :  { %v505_v45 = vadd.f32 1.0, %v2065_v44 }
 0xa25   :  { %2066 = vrcp.f32 %v505_v45 }
 0xa2f   :  { %v2067_v47 = vpop.eup %2066 }
 0xa30   :  { %v512_v51 = vmul.f32 %v2067_v47, %v510_v50 }
 0xa93   :  { %v515_v48 = vpop.permute.xlu1 %514 }
 0xa94   :  { %v517_v49 = vmul.f32 %v2067_v47, %v515_v48 }
 0xa96   :  { %519 = vrot.lane.b32.xlu0 %v517_v49, %s2243_s14 }
 0xb08   :  { %v520_v52 = vpop.permute.xlu0 %519 }
 0xb09   :  { %v522_v53 = vadd.f32 %v520_v52, %v512_v51 }
 0xb0b   :  { %2068 = vtanh.f32 %v522_v53  ;;  %v592_v11 = vrot.slane %v522_v53, 6 }
 0xb15   :  { %v2069_v26 = vpop.eup %2068 }
 0xb16   :  { %525 = vrot.lane.b32.xlu1 %v2069_v26, %s2239_s13 }
 0xb88   :  { %v526_v54 = vpop.permute.xlu1 %525 }
 0xb89   :  { %v2445_v55 = vmul.f32 %v2067_v47, %v526_v54 }
 0xb8b   :  { %v535_v56 = vpack.c.bf16 %v2445_v55, %v2445_v55 }
 0xb8d   :  { %v537_v57 = vrot.slane %v535_v56, 3 }
 0xb8f   :  { %538 = vrot.lane.b32.xlu0 %v537_v57, %s2243_s14 }
 0xc01   :  { %v539_v58 = vpop.permute.xlu0 %538 }
 0xc02   :  { %1911 = vmatmul.mubr.msk.bf16.vlgmr.msra.gmra.mrb[12].mxu0 %vm139_vm3, %v539_v58 }
 0xc03   :  { %1923 = vmatpush3.bf16.msra.mxu0 %v2342_v6  ;;  %1926 = vmatprep.mubr.msk.bf16.mxu0 %vm2242_vm0, %v2241_v0 }
 0xc04   :  { %1924 = vmatprep.subr.bf16.mxu0 %v2241_v0 }
 0xc07   :  { %1925 = vmatpush3.bf16.msra.mxu0 %v2354_v8 }
 0xc08   :  { %1938 = vmatprep.subr.bf16.mxu0 %v2241_v0 }
 0xcd5   :  { %v577_v59 = vpop.f32.mrb[12].mxu0 }
 0xcd6   :  { %v583_v60 = vadd.f32 %v577_v59, %v2387_v29  ;;  %v1912_v61 = vpop.f32.mrb[13].mxu0 }
 0xcd7   :  { %v580_v62 = vpop.f32.mrb[14].mxu0 }
 0xcd8   :  { %2070 = vtanh.f32 %v583_v60  ;;  %v1913_v63 = vpop.f32.mrb[15].mxu0  ;;  %v1761_v2 = vmul.f32 -1.442695, %v583_v60 }
 0xcda   :  { %2072 = vpow2.f32 %v1761_v2 }
 0xce2   :  { %v2071_v1 = vpop.eup %2070 }
 0xce3   :  { %596 = vrot.lane.b32.xlu1 %v2071_v1, %s2239_s13 }
 0xce4   :  { %v2073_v3 = vpop.eup %2072 }
 0xce5   :  { %v587_v4 = vadd.f32 1.0, %v2073_v3 }
 0xce7   :  { %2074 = vrcp.f32 %v587_v4 }
 0xcf1   :  { %v2075_v7 = vpop.eup %2074 }
 0xcf2   :  { %v594_v12 = vmul.f32 %v2075_v7, %v592_v11 }
 0xd55   :  { %v597_v9 = vpop.permute.xlu1 %596 }
 0xd56   :  { %v599_v10 = vmul.f32 %v2075_v7, %v597_v9 }
 0xd58   :  { %601 = vrot.lane.b32.xlu0 %v599_v10, %s2243_s14 }
 0xdca   :  { %v602_v13 = vpop.permute.xlu0 %601 }
 0xdcb   :  { %v604_v14 = vadd.f32 %v602_v13, %v594_v12 }
 0xdcd   :  { %2076 = vtanh.f32 %v604_v14  ;;  %v675_v34 = vrot.slane %v604_v14, 6 }
 0xdd7   :  { %v2077_v15 = vpop.eup %2076 }
 0xdd8   :  { %607 = vrot.lane.b32.xlu1 %v2077_v15, %s2239_s13 }
 0xe4a   :  { %v608_v16 = vpop.permute.xlu1 %607 }
 0xe4b   :  { %v2461_v17 = vmul.f32 %v2075_v7, %v608_v16 }
 0xe4d   :  { %v616_v18 = vpack.c.bf16 %v2461_v17, %v2461_v17 }
 0xe4f   :  { %618 = vrot.lane.b32.xlu0 %v616_v18, %s2243_s14 }
 0xec1   :  { %v619_v19 = vpop.permute.xlu0 %618 }
 0xec2   :  { %1919 = vmatmul.mubr.msk.bf16.vlgmr.msra.gmra.mrb[12].mxu1 %vm139_vm3, %v619_v19 }
 0xec3   :  { %1931 = vmatpush3.bf16.msra.mxu1 %v2342_v6  ;;  %1934 = vmatprep.mubr.msk.bf16.mxu1 %vm2242_vm0, %v2241_v0 }
 0xec4   :  { %1932 = vmatprep.subr.bf16.mxu1 %v2241_v0 }
 0xec7   :  { %1933 = vmatpush3.bf16.msra.mxu1 %v2354_v8 }
 0xec8   :  { %1946 = vmatprep.subr.bf16.mxu1 %v2241_v0 }
 0xf95   :  { %v657_v20 = vpop.f32.mrb[12].mxu1 }
 0xf96   :  { %v664_v21 = vrot.slane %v657_v20, 6  ;;  %v1920_v22 = vpop.f32.mrb[13].mxu1 }
 0xf97   :  { %v660_v23 = vpop.f32.mrb[14].mxu1 }
 0xf98   :  { %v666_v24 = vadd.f32 %v664_v21, %v2387_v29  ;;  %v1921_v25 = vpop.f32.mrb[15].mxu1 }
 0xf9a   :  { %2078 = vtanh.f32 %v666_v24  ;;  %v1763_v6 = vmul.f32 -1.442695, %v666_v24 }
 0xf9c   :  { %2080 = vpow2.f32 %v1763_v6  ;;  %v2032_v6 = vld [vmem:[%s2748_s5 + $0x10] sm:$0xff]  }
 0xfa4   :  { %v2079_v27 = vpop.eup %2078 }
 0xfa5   :  { %679 = vrot.lane.b32.xlu1 %v2079_v27, %s2239_s13 }
 0xfa6   :  { %v2081_v28 = vpop.eup %2080 }
 0xfa7   :  { %v670_v30 = vadd.f32 1.0, %v2081_v28  ;;  %v2520_v28 = vld [vmem:[#allocation3 + $0x10] sm:$0xff]  }
 0xfa9   :  { %2082 = vrcp.f32 %v670_v30  ;;  %v2034_v30 = vld [vmem:[%s2748_s5 + $0x18] sm:$0xff]  }
 0xfb3   :  { %v2083_v31 = vpop.eup %2082 }
 0xfb4   :  { %v677_v35 = vmul.f32 %v2083_v31, %v675_v34 }
0x1017   :  { %v680_v8 = vpop.permute.xlu1 %679 }
0x1018   :  { %v682_v33 = vmul.f32 %v2083_v31, %v680_v8 }
0x101a   :  { %684 = vrot.lane.b32.xlu0 %v682_v33, %s2243_s14 }
0x108c   :  { %v685_v36 = vpop.permute.xlu0 %684 }
0x108d   :  { %v687_v37 = vadd.f32 %v685_v36, %v677_v35  ;;  %v1778_v35 = vld [vmem:[%s2745_s2 + $0x2] sm:$0x3] }
0x108f   :  { %2084 = vtanh.f32 %v687_v37  ;;  %v759_v58 = vrot.slane %v687_v37, 6 }
0x1099   :  { %v2085_v38 = vpop.eup %2084 }
0x109a   :  { %690 = vrot.lane.b32.xlu1 %v2085_v38, %s2239_s13 }
0x110c   :  { %v691_v39 = vpop.permute.xlu1 %690 }
0x110d   :  { %v2477_v40 = vmul.f32 %v2083_v31, %v691_v39 }
0x110f   :  { %v699_v41 = vpack.c.bf16 %v2477_v40, %v2477_v40 }
0x1111   :  { %v701_v42 = vrot.slane %v699_v41, 1 }
0x1113   :  { %702 = vrot.lane.b32.xlu0 %v701_v42, %s2243_s14 }
0x1185   :  { %v703_v43 = vpop.permute.xlu0 %702 }
0x1186   :  { %1927 = vmatmul.mubr.msk.bf16.vlgmr.msra.gmra.mrb[16].mxu0 %vm139_vm3, %v703_v43 }
0x1187   :  { %1942 = vmatprep.mubr.msk.bf16.mxu0 %vm2242_vm0, %v2241_v0  ;;  %1939 = vmatpush3.bf16.msra.mxu0 %v2032_v6 }
0x1188   :  { %1940 = vmatprep.subr.bf16.mxu0 %v2241_v0 }
0x118b   :  { %1941 = vmatpush3.bf16.msra.mxu0 %v2034_v30 }
0x118c   :  { %1954 = vmatprep.subr.bf16.mxu0 %v2241_v0 }
0x1259   :  { %v741_v44 = vpop.f32.mrb[16].mxu0 }
0x125a   :  { %v748_v45 = vrot.slane %v741_v44, 4  ;;  %v1928_v47 = vpop.f32.mrb[17].mxu0 }
0x125b   :  { %v744_v48 = vpop.f32.mrb[18].mxu0  ;;  %v1773_v47 = vld [vmem:[%s2750_s7 + $0x1] ss:$0 sm:$0xff]  ;;  %s2244_s7 = smov 96  }
0x125c   :  { %v750_v49 = vadd.f32 %v748_v45, %v2387_v29  ;;  %v1929_v50 = vpop.f32.mrb[19].mxu0 }
0x125e   :  { %2086 = vtanh.f32 %v750_v49  ;;  %v1765_v52 = vmul.f32 -1.442695, %v750_v49 }
0x1260   :  { %2088 = vpow2.f32 %v1765_v52 }
0x1268   :  { %v2087_v51 = vpop.eup %2086 }
0x1269   :  { %763 = vrot.lane.b32.xlu1 %v2087_v51, %s2239_s13 }
0x126a   :  { %v2089_v53 = vpop.eup %2088 }
0x126b   :  { %v754_v26 = vadd.f32 1.0, %v2089_v53 }
0x126d   :  { %2090 = vrcp.f32 %v754_v26 }
0x1277   :  { %v2091_v54 = vpop.eup %2090 }
0x1278   :  { %v761_v59 = vmul.f32 %v2091_v54, %v759_v58 }
0x12db   :  { %v764_v56 = vpop.permute.xlu1 %763 }
0x12dc   :  { %v766_v57 = vmul.f32 %v2091_v54, %v764_v56 }
0x12de   :  { %768 = vrot.lane.b32.xlu0 %v766_v57, %s2243_s14 }
0x1350   :  { %v769_v60 = vpop.permute.xlu0 %768 }
0x1351   :  { %v771_v61 = vadd.f32 %v769_v60, %v761_v59 }
0x1353   :  { %2092 = vtanh.f32 %v771_v61 }
0x135d   :  { %v2093_v62 = vpop.eup %2092 }
0x135e   :  { %774 = vrot.lane.b32.xlu1 %v2093_v62, %s2239_s13 }
0x13d0   :  { %v775_v63 = vpop.permute.xlu1 %774 }
0x13d1   :  { %v777_v1 = vmul.f32 %v2091_v54, %v775_v63 }
0x13d3   :  { %v783_v2 = vpack.c.bf16 %v777_v1, %v777_v1 }
0x13d5   :  { %v785_v3 = vrot.slane %v783_v2, 2 }
0x13d7   :  { %786 = vrot.lane.b32.xlu0 %v785_v3, %s2243_s14 }
0x1449   :  { %v787_v4 = vpop.permute.xlu0 %786 }
0x144a   :  { %1935 = vmatmul.mubr.msk.bf16.vlgmr.msra.gmra.mrb[16].mxu1 %vm139_vm3, %v787_v4 }
0x144b   :  { %1950 = vmatprep.mubr.msk.bf16.mxu1 %vm2242_vm0, %v2241_v0  ;;  %1947 = vmatpush3.bf16.msra.mxu1 %v2520_v28 }
0x144c   :  { %1948 = vmatprep.subr.bf16.mxu1 %v2241_v0 }
0x151d   :  { %v825_v7 = vpop.f32.mrb[16].mxu1 }
0x151e   :  { %v832_v9 = vrot.slane %v825_v7, 2  ;;  %v1936_v10 = vpop.f32.mrb[17].mxu1 }
0x151f   :  { %v828_v11 = vpop.f32.mrb[18].mxu1 }
0x1520   :  { %v834_v12 = vadd.f32 %v832_v9, %v2387_v29  ;;  %v1937_v13 = vpop.f32.mrb[19].mxu1  ;;  %v843_v29 = vrot.slane %v771_v61, 6 }
0x1522   :  { %2094 = vtanh.f32 %v834_v12  ;;  %v1767_v15 = vmul.f32 -1.442695, %v834_v12 }
0x1524   :  { %2096 = vpow2.f32 %v1767_v15 }
0x152c   :  { %v2095_v14 = vpop.eup %2094 }
0x152d   :  { %847 = vrot.lane.b32.xlu1 %v2095_v14, %s2239_s13 }
0x152e   :  { %v2097_v16 = vpop.eup %2096 }
0x152f   :  { %v838_v18 = vadd.f32 1.0, %v2097_v16 }
0x1531   :  { %2098 = vrcp.f32 %v838_v18 }
0x153b   :  { %v2099_v19 = vpop.eup %2098 }
0x153c   :  { %v845_v22 = vmul.f32 %v2099_v19, %v843_v29 }
0x159f   :  { %v848_v20 = vpop.permute.xlu1 %847 }
0x15a0   :  { %v850_v21 = vmul.f32 %v2099_v19, %v848_v20 }
0x15a2   :  { %852 = vrot.lane.b32.xlu0 %v850_v21, %s2243_s14 }
0x15a6   :  { %276 = vrot.lane.b32.xlu0 %v2397_v46, %s2243_s14 }
0x15aa   :  { %445 = vrot.lane.b32.xlu0 %v2429_v32, %s2243_s14 }
0x15ae   :  { %612 = vrot.lane.b32.xlu0 %v2461_v17, %s2243_s14 }
0x15b2   :  { %779 = vrot.lane.b32.xlu0 %v777_v1, %s2243_s14 }
0x1614   :  { %v853_v23 = vpop.permute.xlu0 %852 }
0x1615   :  { %v2503_v24 = vadd.f32 %v853_v23, %v845_v22 }
0x1617   :  { %2100 = vtanh.f32 %v2503_v24 }
0x1618   :  { %v277_v25 = vpop.permute.xlu0 %276 }
0x1619   :  { %280 = vst.msk [vmem:[#allocation2] sm:$0x3] %vm279_vm4, %v277_v25 }
0x161c   :  { %v446_v46 = vpop.permute.xlu0 %445 }
0x161d   :  { %449 = vst.msk [vmem:[#allocation2] sm:$0x30] %vm448_vm5, %v446_v46 }
0x1620   :  { %v613_v32 = vpop.permute.xlu0 %612 }
0x1621   :  { %v2101_v27 = vpop.eup %2100  ;;  %615 = vst.msk [vmem:[#allocation2 + $0x8] sm:$0x3] %vm279_vm4, %v613_v32 }
0x1622   :  { %858 = vrot.lane.b32.xlu1 %v2101_v27, %s2239_s13 }
0x1624   :  { %v780_v17 = vpop.permute.xlu0 %779 }
0x1625   :  { %782 = vst.msk [vmem:[#allocation2 + $0x8] sm:$0x30] %vm448_vm5, %v780_v17 }
0x1626   :  { %360 = vrot.lane.b32.xlu1 %v2413_v5, %s2243_s14  ;;  %v2526_v5 = vld [vmem:[#allocation3 + $0x18] sm:$0xff]  }
0x1627   :  { %1949 = vmatpush3.bf16.msra.mxu1 %v2526_v5 }
0x1628   :  { %1962 = vmatprep.subr.bf16.mxu1 %v2241_v0 }
0x162a   :  { %530 = vrot.lane.b32.xlu1 %v2445_v55, %s2243_s14  ;;  %v1777_v55 = vld [vmem:[%s2744_s1 + $0x2] sm:$0x3] }
0x162b   :  { %v954_v31 = vpack.c.bf16 %v1777_v55, %v1777_v55 }
0x162d   :  { %1951 = vmatmul.mubr.msk.bf16.vlgmr.msra.gmra.mrb[20].mxu1 %vm139_vm3, %v954_v31 }
0x162e   :  { %695 = vrot.lane.b32.xlu1 %v2477_v40, %s2243_s14  ;;  %1963 = vmatpush3.bf16.msra.mxu1 %v2520_v28 }
0x162f   :  { %1966 = vmatprep.mubr.msk.bf16.mxu1 %vm2242_vm0, %v2241_v0  ;;  %1964 = vmatprep.subr.bf16.mxu1 %v2241_v0 }
0x1632   :  { %1965 = vmatpush3.bf16.msra.mxu1 %v2526_v5 }
0x1633   :  { %1978 = vmatprep.subr.bf16.mxu1 %v2241_v0 }
0x1694   :  { %v859_v8 = vpop.permute.xlu1 %858 }
0x1695   :  { %v861_v33 = vmul.f32 %v2099_v19, %v859_v8 }
0x1697   :  { %863 = vrot.lane.b32.xlu1 %v861_v33, %s2243_s14 }
0x1698   :  { %v361_v34 = vpop.permute.xlu1 %360 }
0x1699   :  { %364 = vst.msk [vmem:[#allocation2] sm:$0xc] %vm363_vm6, %v361_v34 }
0x169b   :  { %1019 = vrot.lane.b32.xlu1 %v1778_v35, %s2243_s14 }
0x169c   :  { %v531_v36 = vpop.permute.xlu1 %530 }
0x169d   :  { %534 = vst.msk [vmem:[#allocation2] sm:$0xc0] %vm533_vm7, %v531_v36 }
0x16a0   :  { %v696_v37 = vpop.permute.xlu1 %695 }
0x16a1   :  { %698 = vst.msk [vmem:[#allocation2 + $0x8] sm:$0xc] %vm363_vm6, %v696_v37 }
0x16a4   :  { %v873_v39 = vld [vmem:[#allocation2] sm:$0xff] }
0x1700   :  { %v1004_v42 = vpop.f32.mrb[20].mxu1 }
0x1701   :  { %v1952_v43 = vpop.f32.mrb[21].mxu1 }
0x1702   :  { %v1007_v44 = vpop.f32.mrb[22].mxu1 }
0x1703   :  { %v1953_v45 = vpop.f32.mrb[23].mxu1 }
0x1709   :  { %v864_v38 = vpop.permute.xlu1 %863 }
0x170a   :  { %866 = vst.msk [vmem:[#allocation2 + $0x8] sm:$0xc0] %vm533_vm7, %v864_v38  ;;  %867 = vst.msk [vmem:[#allocation6 - $0x6] sm:$0xc0] %vm533_vm7, %v864_v38 }
0x170d   :  { %v1020_v62 = vpop.permute.xlu1 %1019 }
0x1711   :  { %v874_v40 = vld [vmem:[#allocation2 + $0x8] sm:$0xff] }
0x1712   :  { %v875_v41 = vpack.c.bf16 %v874_v40, %v873_v39 }
0x1714   :  { %1943 = vmatmul.mubr.msk.bf16.vlgmr.msra.gmra.mrb[20].mxu0 %vm139_vm3, %v875_v41 }
0x1715   :  { %1955 = vmatpush3.bf16.msra.mxu0 %v2520_v28  ;;  %1958 = vmatprep.mubr.msk.bf16.mxu0 %vm2242_vm0, %v2241_v0 }
0x1716   :  { %1956 = vmatprep.subr.bf16.mxu0 %v2241_v0 }
0x1719   :  { %1957 = vmatpush3.bf16.msra.mxu0 %v2526_v5 }
0x171a   :  { %1970 = vmatprep.subr.bf16.mxu0 %v2241_v0 }
0x17e7   :  { %v938_v48 = vpop.f32.mrb[20].mxu0 }
0x17e8   :  { %v2563_v49 = vadd.f32 %v1773_v47, %v938_v48  ;;  %v1944_v50 = vpop.f32.mrb[21].mxu0 }
0x17e9   :  { %v941_v51 = vpop.f32.mrb[22].mxu0 }
0x17ea   :  { %v1010_v52 = vadd.f32 %v1004_v42, %v2563_v49  ;;  %v2566_v53 = vadd.f32 %v1773_v47, %v941_v51  ;;  %v1945_v26 = vpop.f32.mrb[23].mxu0 }
0x17ec   :  { %2102 = vtanh.f32 %v1010_v52  ;;  %v1782_v56 = vmul.f32 -1.442695, %v1010_v52 }
0x17ee   :  { %2104 = vpow2.f32 %v1782_v56 }
0x17f6   :  { %v2103_v54 = vpop.eup %2102 }
0x17f7   :  { %1024 = vrot.lane.b32.xlu0 %v2103_v54, %s2239_s13 }
0x17f8   :  { %v2105_v57 = vpop.eup %2104 }
0x17f9   :  { %v1014_v58 = vadd.f32 1.0, %v2105_v57 }
0x17fb   :  { %2106 = vrcp.f32 %v1014_v58 }
0x1805   :  { %v2107_v59 = vpop.eup %2106 }
0x1806   :  { %v1022_v63 = vmul.f32 %v2107_v59, %v1020_v62 }
0x1869   :  { %v1025_v60 = vpop.permute.xlu0 %1024 }
0x186a   :  { %v1027_v61 = vmul.f32 %v2107_v59, %v1025_v60 }
0x186c   :  { %1029 = vrot.lane.b32.xlu0 %v1027_v61, %s2243_s14 }
0x18de   :  { %v1030_v1 = vpop.permute.xlu0 %1029 }
0x18df   :  { %v1032_v2 = vadd.f32 %v1030_v1, %v1022_v63 }
0x18e1   :  { %2108 = vtanh.f32 %v1032_v2  ;;  %v1103_v25 = vrot.slane %v1032_v2, 6 }
0x18eb   :  { %v2109_v3 = vpop.eup %2108 }
0x18ec   :  { %1035 = vrot.lane.b32.xlu1 %v2109_v3, %s2239_s13 }
0x195e   :  { %v1036_v4 = vpop.permute.xlu1 %1035 }
0x195f   :  { %v2571_v7 = vmul.f32 %v2107_v59, %v1036_v4 }
0x1961   :  { %v1044_v9 = vpack.c.bf16 %v2571_v7, %v2571_v7 }
0x1963   :  { %1046 = vrot.lane.b32.xlu0 %v1044_v9, %s2243_s14 }
0x19d5   :  { %v1047_v10 = vpop.permute.xlu0 %1046 }
0x19d6   :  { %1959 = vmatmul.mubr.msk.bf16.vlgmr.msra.gmra.mrb[24].mxu0 %vm139_vm3, %v1047_v10 }
0x19d7   :  { %1971 = vmatpush3.bf16.msra.mxu0 %v2520_v28  ;;  %1974 = vmatprep.mubr.msk.bf16.mxu0 %vm2242_vm0, %v2241_v0 }
0x19d8   :  { %1972 = vmatprep.subr.bf16.mxu0 %v2241_v0 }
0x19db   :  { %1973 = vmatpush3.bf16.msra.mxu0 %v2526_v5 }
0x19dc   :  { %1986 = vmatprep.subr.bf16.mxu0 %v2241_v0 }
0x1aa9   :  { %v1085_v11 = vpop.f32.mrb[24].mxu0 }
0x1aaa   :  { %v1092_v12 = vrot.slane %v1085_v11, 6  ;;  %v1960_v13 = vpop.f32.mrb[25].mxu0 }
0x1aab   :  { %v1088_v14 = vpop.f32.mrb[26].mxu0 }
0x1aac   :  { %v1094_v15 = vadd.f32 %v1092_v12, %v2563_v49  ;;  %v1961_v16 = vpop.f32.mrb[27].mxu0 }
0x1aae   :  { %2110 = vtanh.f32 %v1094_v15  ;;  %v1784_v19 = vmul.f32 -1.442695, %v1094_v15 }
0x1ab0   :  { %2112 = vpow2.f32 %v1784_v19 }
0x1ab8   :  { %v2111_v18 = vpop.eup %2110 }
0x1ab9   :  { %1107 = vrot.lane.b32.xlu1 %v2111_v18, %s2239_s13 }
0x1aba   :  { %v2113_v20 = vpop.eup %2112 }
0x1abb   :  { %v1098_v21 = vadd.f32 1.0, %v2113_v20 }
0x1abd   :  { %2114 = vrcp.f32 %v1098_v21 }
0x1ac7   :  { %v2115_v29 = vpop.eup %2114 }
0x1ac8   :  { %v1105_v46 = vmul.f32 %v2115_v29, %v1103_v25 }
0x1b2b   :  { %v1108_v22 = vpop.permute.xlu1 %1107 }
0x1b2c   :  { %v1110_v23 = vmul.f32 %v2115_v29, %v1108_v22 }
0x1b2e   :  { %1112 = vrot.lane.b32.xlu0 %v1110_v23, %s2243_s14 }
0x1ba0   :  { %v1113_v32 = vpop.permute.xlu0 %1112 }
0x1ba1   :  { %v1115_v27 = vadd.f32 %v1113_v32, %v1105_v46 }
0x1ba3   :  { %2116 = vtanh.f32 %v1115_v27  ;;  %v1187_v47 = vrot.slane %v1115_v27, 6 }
0x1bad   :  { %v2117_v17 = vpop.eup %2116 }
0x1bae   :  { %1118 = vrot.lane.b32.xlu1 %v2117_v17, %s2239_s13 }
0x1c20   :  { %v1119_v6 = vpop.permute.xlu1 %1118 }
0x1c21   :  { %v2587_v30 = vmul.f32 %v2115_v29, %v1119_v6 }
0x1c23   :  { %v1127_v55 = vpack.c.bf16 %v2587_v30, %v2587_v30 }
0x1c25   :  { %v1129_v31 = vrot.slane %v1127_v55, 1 }
0x1c27   :  { %1130 = vrot.lane.b32.xlu0 %v1129_v31, %s2243_s14 }
0x1c99   :  { %v1131_v8 = vpop.permute.xlu0 %1130 }
0x1c9a   :  { %1967 = vmatmul.mubr.msk.bf16.vlgmr.msra.gmra.mrb[24].mxu1 %vm139_vm3, %v1131_v8 }
0x1c9b   :  { %1979 = vmatpush3.bf16.msra.mxu1 %v2520_v28  ;;  %1982 = vmatprep.mubr.msk.bf16.mxu1 %vm2242_vm0, %v2241_v0 }
0x1c9c   :  { %1980 = vmatprep.subr.bf16.mxu1 %v2241_v0 }
0x1c9f   :  { %1981 = vmatpush3.bf16.msra.mxu1 %v2526_v5 }
0x1ca0   :  { %1994 = vmatprep.subr.bf16.mxu1 %v2241_v0 }
0x1d6d   :  { %v1169_v33 = vpop.f32.mrb[24].mxu1 }
0x1d6e   :  { %v1176_v34 = vrot.slane %v1169_v33, 4  ;;  %v1968_v35 = vpop.f32.mrb[25].mxu1 }
0x1d6f   :  { %v1172_v36 = vpop.f32.mrb[26].mxu1 }
0x1d70   :  { %v1178_v37 = vadd.f32 %v1176_v34, %v2563_v49  ;;  %v1969_v38 = vpop.f32.mrb[27].mxu1 }
0x1d72   :  { %2118 = vtanh.f32 %v1178_v37  ;;  %v1786_v40 = vmul.f32 -1.442695, %v1178_v37 }
0x1d74   :  { %2120 = vpow2.f32 %v1786_v40 }
0x1d7c   :  { %v2119_v39 = vpop.eup %2118 }
0x1d7d   :  { %1191 = vrot.lane.b32.xlu1 %v2119_v39, %s2239_s13 }
0x1d7e   :  { %v2121_v41 = vpop.eup %2120 }
0x1d7f   :  { %v1182_v42 = vadd.f32 1.0, %v2121_v41 }
0x1d81   :  { %2122 = vrcp.f32 %v1182_v42 }
0x1d8b   :  { %v2123_v43 = vpop.eup %2122 }
0x1d8c   :  { %v1189_v48 = vmul.f32 %v2123_v43, %v1187_v47 }
0x1def   :  { %v1192_v44 = vpop.permute.xlu1 %1191 }
0x1df0   :  { %v1194_v45 = vmul.f32 %v2123_v43, %v1192_v44 }
0x1df2   :  { %1196 = vrot.lane.b32.xlu0 %v1194_v45, %s2243_s14 }
0x1e64   :  { %v1197_v50 = vpop.permute.xlu0 %1196 }
0x1e65   :  { %v1199_v51 = vadd.f32 %v1197_v50, %v1189_v48 }
0x1e67   :  { %2124 = vtanh.f32 %v1199_v51  ;;  %v1271_v13 = vrot.slane %v1199_v51, 6 }
0x1e71   :  { %v2125_v52 = vpop.eup %2124 }
0x1e72   :  { %1202 = vrot.lane.b32.xlu1 %v2125_v52, %s2239_s13 }
0x1ee4   :  { %v1203_v26 = vpop.permute.xlu1 %1202 }
0x1ee5   :  { %v2603_v54 = vmul.f32 %v2123_v43, %v1203_v26 }
0x1ee7   :  { %v1211_v56 = vpack.c.bf16 %v2603_v54, %v2603_v54 }
0x1ee9   :  { %v1213_v57 = vrot.slane %v1211_v56, 2 }
0x1eeb   :  { %1214 = vrot.lane.b32.xlu0 %v1213_v57, %s2243_s14 }
0x1f5d   :  { %v1215_v58 = vpop.permute.xlu0 %1214 }
0x1f5e   :  { %1975 = vmatmul.mubr.msk.bf16.vlgmr.msra.gmra.mrb[28].mxu0 %vm139_vm3, %v1215_v58 }
0x1f5f   :  { %1987 = vmatpush3.bf16.msra.mxu0 %v2520_v28  ;;  %1990 = vmatprep.mubr.msk.bf16.mxu0 %vm2242_vm0, %v2241_v0 }
0x1f60   :  { %1988 = vmatprep.subr.bf16.mxu0 %v2241_v0 }
0x1f63   :  { %1989 = vmatpush3.bf16.msra.mxu0 %v2526_v5 }
0x1f64   :  { %2002 = vmatprep.subr.bf16.mxu0 %v2241_v0 }
0x2031   :  { %v1253_v59 = vpop.f32.mrb[28].mxu0 }
0x2032   :  { %v1260_v60 = vrot.slane %v1253_v59, 2  ;;  %v1976_v61 = vpop.f32.mrb[29].mxu0 }
0x2033   :  { %v1256_v62 = vpop.f32.mrb[30].mxu0 }
0x2034   :  { %v1262_v63 = vadd.f32 %v1260_v60, %v2563_v49  ;;  %v1977_v1 = vpop.f32.mrb[31].mxu0 }
0x2036   :  { %2126 = vtanh.f32 %v1262_v63  ;;  %v1788_v3 = vmul.f32 -1.442695, %v1262_v63 }
0x2038   :  { %2128 = vpow2.f32 %v1788_v3 }
0x2040   :  { %v2127_v2 = vpop.eup %2126 }
0x2041   :  { %1275 = vrot.lane.b32.xlu1 %v2127_v2, %s2239_s13 }
0x2042   :  { %v2129_v4 = vpop.eup %2128 }
0x2043   :  { %v1266_v9 = vadd.f32 1.0, %v2129_v4 }
0x2045   :  { %2130 = vrcp.f32 %v1266_v9 }
0x204f   :  { %v2131_v10 = vpop.eup %2130 }
0x2050   :  { %v1273_v14 = vmul.f32 %v2131_v10, %v1271_v13 }
0x20b3   :  { %v1276_v11 = vpop.permute.xlu1 %1275 }
0x20b4   :  { %v1278_v12 = vmul.f32 %v2131_v10, %v1276_v11 }
0x20b6   :  { %1280 = vrot.lane.b32.xlu0 %v1278_v12, %s2243_s14 }
0x2128   :  { %v1281_v15 = vpop.permute.xlu0 %1280 }
0x2129   :  { %v1283_v16 = vadd.f32 %v1281_v15, %v1273_v14 }
0x212b   :  { %2132 = vtanh.f32 %v1283_v16  ;;  %v1352_v34 = vrot.slane %v1283_v16, 6 }
0x2135   :  { %v2133_v49 = vpop.eup %2132 }
0x2136   :  { %1286 = vrot.lane.b32.xlu1 %v2133_v49, %s2239_s13 }
0x21a8   :  { %v1287_v18 = vpop.permute.xlu1 %1286 }
0x21a9   :  { %v2619_v19 = vmul.f32 %v2131_v10, %v1287_v18 }
0x21ab   :  { %v1295_v20 = vpack.c.bf16 %v2619_v19, %v2619_v19 }
0x21ad   :  { %v1297_v21 = vrot.slane %v1295_v20, 3 }
0x21af   :  { %1298 = vrot.lane.b32.xlu0 %v1297_v21, %s2243_s14 }
0x2221   :  { %v1299_v29 = vpop.permute.xlu0 %1298 }
0x2222   :  { %1983 = vmatmul.mubr.msk.bf16.vlgmr.msra.gmra.mrb[28].mxu1 %vm139_vm3, %v1299_v29 }
0x2223   :  { %1995 = vmatpush3.bf16.msra.mxu1 %v2520_v28  ;;  %1998 = vmatprep.mubr.msk.bf16.mxu1 %vm2242_vm0, %v2241_v0 }
0x2224   :  { %1996 = vmatprep.subr.bf16.mxu1 %v2241_v0 }
0x2227   :  { %1997 = vmatpush3.bf16.msra.mxu1 %v2526_v5 }
0x2228   :  { %2010 = vmatprep.subr.bf16.mxu1 %v2241_v0 }
0x22f5   :  { %v1337_v22 = vpop.f32.mrb[28].mxu1 }
0x22f6   :  { %v1343_v23 = vadd.f32 %v1337_v22, %v2566_v53  ;;  %v1984_v25 = vpop.f32.mrb[29].mxu1 }
0x22f7   :  { %v1340_v46 = vpop.f32.mrb[30].mxu1 }
0x22f8   :  { %2134 = vtanh.f32 %v1343_v23  ;;  %v1985_v32 = vpop.f32.mrb[31].mxu1  ;;  %v1790_v17 = vmul.f32 -1.442695, %v1343_v23 }
0x22fa   :  { %2136 = vpow2.f32 %v1790_v17 }
0x2302   :  { %v2135_v27 = vpop.eup %2134 }
0x2303   :  { %1356 = vrot.lane.b32.xlu1 %v2135_v27, %s2239_s13 }
0x2304   :  { %v2137_v6 = vpop.eup %2136 }
0x2305   :  { %v1347_v55 = vadd.f32 1.0, %v2137_v6 }
0x2307   :  { %2138 = vrcp.f32 %v1347_v55 }
0x2311   :  { %v2139_v31 = vpop.eup %2138 }
0x2312   :  { %v1354_v35 = vmul.f32 %v2139_v31, %v1352_v34 }
0x2375   :  { %v1357_v8 = vpop.permute.xlu1 %1356 }
0x2376   :  { %v1359_v33 = vmul.f32 %v2139_v31, %v1357_v8 }
0x2378   :  { %1361 = vrot.lane.b32.xlu0 %v1359_v33, %s2243_s14 }
0x23ea   :  { %v1362_v36 = vpop.permute.xlu0 %1361 }
0x23eb   :  { %v1364_v37 = vadd.f32 %v1362_v36, %v1354_v35 }
0x23ed   :  { %2140 = vtanh.f32 %v1364_v37 }
0x23f7   :  { %v2141_v38 = vpop.eup %2140 }
0x23f8   :  { %1367 = vrot.lane.b32.xlu1 %v2141_v38, %s2239_s13 }
0x246a   :  { %v1368_v39 = vpop.permute.xlu1 %1367 }
0x246b   :  { %v2635_v40 = vmul.f32 %v2139_v31, %v1368_v39 }
0x246d   :  { %v1376_v41 = vpack.c.bf16 %v2635_v40, %v2635_v40 }
0x246f   :  { %1378 = vrot.lane.b32.xlu0 %v1376_v41, %s2243_s14 }
0x24e1   :  { %v1379_v42 = vpop.permute.xlu0 %1378 }
0x24e2   :  { %1991 = vmatmul.mubr.msk.bf16.vlgmr.msra.gmra.mrb[32].mxu0 %vm139_vm3, %v1379_v42 }
0x24e3   :  { %2003 = vmatpush3.bf16.msra.mxu0 %v2520_v28  ;;  %2006 = vmatprep.mubr.msk.bf16.mxu0 %vm2242_vm0, %v2241_v0 }
0x24e4   :  { %2004 = vmatprep.subr.bf16.mxu0 %v2241_v0 }
0x24e7   :  { %2005 = vmatpush3.bf16.msra.mxu0 %v2526_v5  ;;  %v1435_v5 = vrot.slane %v1364_v37, 6 }
0x25b5   :  { %v1417_v43 = vpop.f32.mrb[32].mxu0 }
0x25b6   :  { %v1424_v44 = vrot.slane %v1417_v43, 6  ;;  %v1992_v45 = vpop.f32.mrb[33].mxu0 }
0x25b7   :  { %v1420_v47 = vpop.f32.mrb[34].mxu0 }
0x25b8   :  { %v1426_v48 = vadd.f32 %v1424_v44, %v2566_v53  ;;  %v1993_v50 = vpop.f32.mrb[35].mxu0 }
0x25ba   :  { %2142 = vtanh.f32 %v1426_v48  ;;  %v1792_v52 = vmul.f32 -1.442695, %v1426_v48 }
0x25bc   :  { %2144 = vpow2.f32 %v1792_v52 }
0x25c4   :  { %v2143_v51 = vpop.eup %2142 }
0x25c5   :  { %1439 = vrot.lane.b32.xlu1 %v2143_v51, %s2239_s13 }
0x25c6   :  { %v2145_v28 = vpop.eup %2144 }
0x25c7   :  { %v1430_v26 = vadd.f32 1.0, %v2145_v28  ;;  %v2036_v28 = vld [vmem:[%s2751_s8] sm:$0xff]  }
0x25c9   :  { %2146 = vrcp.f32 %v1430_v26 }
0x25d3   :  { %v2147_v56 = vpop.eup %2146 }
0x25d4   :  { %v1437_v59 = vmul.f32 %v2147_v56, %v1435_v5 }
0x2637   :  { %v1440_v57 = vpop.permute.xlu1 %1439 }
0x2638   :  { %v1442_v58 = vmul.f32 %v2147_v56, %v1440_v57 }
0x263a   :  { %1444 = vrot.lane.b32.xlu0 %v1442_v58, %s2243_s14 }
0x26ac   :  { %v1445_v60 = vpop.permute.xlu0 %1444 }
0x26ad   :  { %v1447_v61 = vadd.f32 %v1445_v60, %v1437_v59 }
0x26af   :  { %2148 = vtanh.f32 %v1447_v61  ;;  %v1519_v22 = vrot.slane %v1447_v61, 6 }
0x26b9   :  { %v2149_v62 = vpop.eup %2148 }
0x26ba   :  { %1450 = vrot.lane.b32.xlu1 %v2149_v62, %s2239_s13 }
0x272c   :  { %v1451_v63 = vpop.permute.xlu1 %1450 }
0x272d   :  { %v2650_v1 = vmul.f32 %v2147_v56, %v1451_v63 }
0x272f   :  { %v1459_v2 = vpack.c.bf16 %v2650_v1, %v2650_v1 }
0x2731   :  { %v1461_v3 = vrot.slane %v1459_v2, 1 }
0x2733   :  { %1462 = vrot.lane.b32.xlu0 %v1461_v3, %s2243_s14 }
0x27a5   :  { %v1463_v4 = vpop.permute.xlu0 %1462 }
0x27a6   :  { %1999 = vmatmul.mubr.msk.bf16.vlgmr.msra.gmra.mrb[32].mxu1 %vm139_vm3, %v1463_v4 }
0x27a7   :  { %2014 = vmatprep.mubr.msk.bf16.mxu1 %vm2242_vm0, %v2241_v0  ;;  %2011 = vmatpush3.bf16.msra.mxu1 %v2036_v28 }
0x27a8   :  { %2012 = vmatprep.subr.bf16.mxu1 %v2241_v0 }
0x2879   :  { %v1501_v9 = vpop.f32.mrb[32].mxu1 }
0x287a   :  { %v1508_v10 = vrot.slane %v1501_v9, 4  ;;  %v2000_v11 = vpop.f32.mrb[33].mxu1 }
0x287b   :  { %v1504_v12 = vpop.f32.mrb[34].mxu1 }
0x287c   :  { %v1510_v13 = vadd.f32 %v1508_v10, %v2566_v53  ;;  %v2001_v14 = vpop.f32.mrb[35].mxu1 }
0x287e   :  { %2150 = vtanh.f32 %v1510_v13  ;;  %v1794_v16 = vmul.f32 -1.442695, %v1510_v13 }
0x2880   :  { %2152 = vpow2.f32 %v1794_v16 }
0x2888   :  { %v2151_v15 = vpop.eup %2150 }
0x2889   :  { %1523 = vrot.lane.b32.xlu1 %v2151_v15, %s2239_s13 }
0x288a   :  { %v2153_v49 = vpop.eup %2152 }
0x288b   :  { %v1514_v18 = vadd.f32 1.0, %v2153_v49 }
0x288d   :  { %2154 = vrcp.f32 %v1514_v18 }
0x2897   :  { %v2155_v20 = vpop.eup %2154 }
0x2898   :  { %v1521_v23 = vmul.f32 %v2155_v20, %v1519_v22 }
0x28fb   :  { %v1524_v21 = vpop.permute.xlu1 %1523 }
0x28fc   :  { %v1526_v29 = vmul.f32 %v2155_v20, %v1524_v21 }
0x28fe   :  { %1528 = vrot.lane.b32.xlu0 %v1526_v29, %s2243_s14 }
0x2970   :  { %v1529_v25 = vpop.permute.xlu0 %1528 }
0x2971   :  { %v1531_v46 = vadd.f32 %v1529_v25, %v1521_v23 }
0x2973   :  { %2156 = vtanh.f32 %v1531_v46 }
0x297d   :  { %v2157_v32 = vpop.eup %2156 }
0x297e   :  { %1534 = vrot.lane.b32.xlu1 %v2157_v32, %s2239_s13 }
0x29f0   :  { %v1535_v27 = vpop.permute.xlu1 %1534 }
0x29f1   :  { %v1537_v17 = vmul.f32 %v2155_v20, %v1535_v27 }
0x29f3   :  { %v1543_v6 = vpack.c.bf16 %v1537_v17, %v1537_v17 }
0x29f5   :  { %v1545_v55 = vrot.slane %v1543_v6, 2 }
0x29f7   :  { %1546 = vrot.lane.b32.xlu0 %v1545_v55, %s2243_s14 }
0x2a69   :  { %v1547_v31 = vpop.permute.xlu0 %1546 }
0x2a6a   :  { %2007 = vmatmul.mubr.msk.bf16.vlgmr.msra.gmra.mrb[36].mxu0 %vm139_vm3, %v1547_v31 }
0x2b3d   :  { %v1585_v8 = vpop.f32.mrb[36].mxu0 }
0x2b3e   :  { %v1592_v33 = vrot.slane %v1585_v8, 2  ;;  %v2008_v34 = vpop.f32.mrb[37].mxu0 }
0x2b3f   :  { %v1588_v35 = vpop.f32.mrb[38].mxu0 }
0x2b40   :  { %v1594_v36 = vadd.f32 %v1592_v33, %v2566_v53  ;;  %v2009_v37 = vpop.f32.mrb[39].mxu0  ;;  %v1603_v53 = vrot.slane %v1531_v46, 6 }
0x2b42   :  { %2158 = vtanh.f32 %v1594_v36  ;;  %v1796_v39 = vmul.f32 -1.442695, %v1594_v36 }
0x2b44   :  { %2160 = vpow2.f32 %v1796_v39 }
0x2b4c   :  { %v2159_v38 = vpop.eup %2158 }
0x2b4d   :  { %1607 = vrot.lane.b32.xlu1 %v2159_v38, %s2239_s13 }
0x2b4e   :  { %v2161_v41 = vpop.eup %2160 }
0x2b4f   :  { %v1598_v42 = vadd.f32 1.0, %v2161_v41 }
0x2b51   :  { %2162 = vrcp.f32 %v1598_v42 }
0x2b5b   :  { %v2163_v43 = vpop.eup %2162 }
0x2b5c   :  { %v1605_v47 = vmul.f32 %v2163_v43, %v1603_v53 }
0x2bbf   :  { %v1608_v44 = vpop.permute.xlu1 %1607 }
0x2bc0   :  { %v1610_v45 = vmul.f32 %v2163_v43, %v1608_v44 }
0x2bc2   :  { %1612 = vrot.lane.b32.xlu0 %v1610_v45, %s2243_s14 }
0x2bc6   :  { %1040 = vrot.lane.b32.xlu0 %v2571_v7, %s2243_s14 }
0x2bca   :  { %1207 = vrot.lane.b32.xlu0 %v2603_v54, %s2243_s14 }
0x2bce   :  { %1372 = vrot.lane.b32.xlu0 %v2635_v40, %s2243_s14 }
0x2bd2   :  { %1539 = vrot.lane.b32.xlu0 %v1537_v17, %s2243_s14 }
0x2bd6   :  { %869 = vrot.lane.b32.xlu0 %v2503_v24, %s2244_s7 }
0x2c34   :  { %v1613_v48 = vpop.permute.xlu0 %1612 }
0x2c35   :  { %v1615_v50 = vadd.f32 %v1613_v48, %v1605_v47 }
0x2c37   :  { %2164 = vtanh.f32 %v1615_v50 }
0x2c38   :  { %v1041_v51 = vpop.permute.xlu0 %1040 }
0x2c39   :  { %1043 = vst.msk [vmem:[#allocation2] sm:$0x3] %vm279_vm4, %v1041_v51 }
0x2c3c   :  { %v1208_v7 = vpop.permute.xlu0 %1207 }
0x2c3d   :  { %1210 = vst.msk [vmem:[#allocation2] sm:$0x30] %vm448_vm5, %v1208_v7 }
0x2c40   :  { %v1373_v54 = vpop.permute.xlu0 %1372 }
0x2c41   :  { %v2165_v52 = vpop.eup %2164  ;;  %1375 = vst.msk [vmem:[#allocation2 + $0x8] sm:$0x3] %vm279_vm4, %v1373_v54 }
0x2c42   :  { %1618 = vrot.lane.b32.xlu1 %v2165_v52, %s2239_s13 }
0x2c44   :  { %v1540_v40 = vpop.permute.xlu0 %1539 }
0x2c45   :  { %1542 = vst.msk [vmem:[#allocation2 + $0x8] sm:$0x30] %vm448_vm5, %v1540_v40 }
0x2c46   :  { %1123 = vrot.lane.b32.xlu1 %v2587_v30, %s2243_s14  ;;  %v2037_v30 = vld [vmem:[%s2751_s8 + $0x8] sm:$0xff]   ;;  %s2245_s8 = smov [#allocation6]  }
0x2c47   :  { %2013 = vmatpush3.bf16.msra.mxu1 %v2037_v30  ;;  %s1714_s0 = sshll.u32 %s2245_s8, 4  ;;  %s1715_s0 = int_to_ptr.vmem [resolvable:$true] %s1714_s0 }
0x2c48   :  { %v870_v24 = vpop.permute.xlu0 %869  ;;  %s2188_s25 = scalar_lea.vmem %s1715_s0, 64  ;;  %p2193_p9 = scmp.lt.s32.totalorder %s1715_s0, %s1715_s0 }
0x2c49   :  { %872 = vst.msk [vmem:[#allocation7 - $0x6] sm:$0xc0] %vm533_vm7, %v870_v24  ;;  %p2189_p8 = scmp.ne.s32.totalorder %s1715_s0, %s2188_s25  ;;  %p2194_p10 = scmp.lt.s32.totalorder %s2188_s25, %s2188_s25 }
0x2c4a   :  { %1291 = vrot.lane.b32.xlu1 %v2619_v19, %s2243_s14 }
0x2c4b   :  { %p2195_p11 = por %p2194_p10, %p2193_p9 }
0x2c4d   :  { %p2196_p12 = pnand %p2195_p11, %p2189_p8 }
0x2c4e   :  { %1455 = vrot.lane.b32.xlu1 %v2650_v1, %s2243_s14 }
0x2cb4   :  { %v1619_v26 = vpop.permute.xlu1 %1618 }
0x2cb5   :  { %v1621_v56 = vmul.f32 %v2163_v43, %v1619_v26 }
0x2cb7   :  { %1623 = vrot.lane.b32.xlu1 %v1621_v56, %s2243_s14 }
0x2cb8   :  { %v1124_v19 = vpop.permute.xlu1 %1123 }
0x2cb9   :  { %1126 = vst.msk [vmem:[#allocation2] sm:$0xc] %vm363_vm6, %v1124_v19 }
0x2cbb   :  { %1630 = vrot.lane.b32.xlu1 %v1615_v50, %s2244_s7 }
0x2cbc   :  { %v1292_v57 = vpop.permute.xlu1 %1291 }
0x2cbd   :  { %1294 = vst.msk [vmem:[#allocation2] sm:$0xc0] %vm533_vm7, %v1292_v57 }
0x2cc0   :  { %v1456_v58 = vpop.permute.xlu1 %1455 }
0x2cc1   :  { %1458 = vst.msk [vmem:[#allocation2 + $0x8] sm:$0xc] %vm363_vm6, %v1456_v58 }
0x2cc4   :  { %v1635_v59 = vld [vmem:[#allocation2] sm:$0xff] }
0x2d29   :  { %v1624_v0 = vpop.permute.xlu1 %1623 }
0x2d2a   :  { %1626 = vst.msk [vmem:[#allocation2 + $0x8] sm:$0xc0] %vm533_vm7, %v1624_v0  ;;  %1628 = vst.msk [vmem:[#allocation6 - $0x4] sm:$0xc0] %vm533_vm7, %v1624_v0 }
0x2d2d   :  { %v1631_v5 = vpop.permute.xlu1 %1630 }
0x2d2e   :  { %1634 = vst.msk [vmem:[#allocation7 - $0x4] sm:$0xc0] %vm533_vm7, %v1631_v5 }
0x2d31   :  { %v1636_v60 = vld [vmem:[#allocation2 + $0x8] sm:$0xff] }
0x2d32   :  { %v1637_v61 = vpack.c.bf16 %v1636_v60, %v1635_v59 }
0x2d34   :  { %2015 = vmatmul.mubr.msk.bf16.vlgmr.msra.gmra.mrb[36].mxu1 %vm139_vm3, %v1637_v61 }
0x2d35   :  { %2199 = shalt.err (!%p2196_p12)
}
0x2d36   :  { %s2200_s4 = scalar_lea.hbm %s2754_s11, 64 }
0x2d37   :  { %p2201_p13 = scmp.ne.s32.totalorder %s2754_s11, %s2200_s4  ;;  %p2204_p0 = scmp.lt.u32.totalorder %s2200_s4, %s2754_s11 }
0x2d39   :  { %p2206_p1 = pnand %p2204_p0, %p2201_p13 }
0x2d3b   :  { %2209 = shalt.err (!%p2206_p1)
}
0x2d3c   :  { %s2247_s16 = smov 2   ;;  %s2210_s6 = scalar_lea.vmem %s1727_s24, 64 }
0x2d3d   :  { %1720 = dma.vmem_to_hbm [thread:$0]  %s1715_s0, 64, %s2754_s11, [#allocation5], %s2243_s14, %s2243_s14, %s2247_s16  }
0x2d3e   :  { %p2211_p2 = scmp.ne.s32.totalorder %s1727_s24, %s2210_s6  ;;  %p2215_p3 = scmp.lt.s32.totalorder %s1727_s24, %s1727_s24 }
0x2d3f   :  { %p2216_p4 = scmp.lt.s32.totalorder %s2210_s6, %s2210_s6 }
0x2d41   :  { %p2217_p5 = por %p2216_p4, %p2215_p3 }
0x2d43   :  { %p2218_p6 = pnand %p2217_p5, %p2211_p2 }
0x2d45   :  { %2221 = shalt.err (!%p2218_p6)
}
0x2d46   :  { %s2222_s5 = scalar_lea.hbm %s2755_s12, 64 }
0x2d47   :  { %p2223_p7 = scmp.ne.s32.totalorder %s2755_s12, %s2222_s5  ;;  %p2226_p8 = scmp.lt.u32.totalorder %s2222_s5, %s2755_s12 }
0x2d49   :  { %p2228_p9 = pnand %p2226_p8, %p2223_p7 }
0x2d4b   :  { %2231 = shalt.err (!%p2228_p9)
}
0x2d4c   :  { %1732 = dma.vmem_to_hbm [thread:$0]  %s1727_s24, 64, %s2755_s12, [#allocation8], %s2243_s14, %s2243_s14, %s2247_s16  }
0x2d4d   :  { %v1797_v62 = vld [vmem:[%s2752_s9] ss:$0 sm:$0xff] }
0x2e07   :  { %v1698_v63 = vpop.f32.mrb[36].mxu1 }
0x2e08   :  { %v1699_v1 = vadd.f32 %v1797_v62, %v1698_v63  ;;  %v2016_v2 = vpop.f32.mrb[37].mxu1 }
0x2e09   :  { %v1701_v3 = vpop.f32.mrb[38].mxu1 }
0x2e0a   :  { %1705 = vst.msk [vmem:[%s2753_s10] sm:$0xff] %vm66_vm2, %v1699_v1  ;;  %v1702_v4 = vadd.f32 %v1797_v62, %v1701_v3  ;;  %v2017_v9 = vpop.f32.mrb[39].mxu1 }
0x2e0c   :  { %1706 = vst.msk [vmem:[%s2753_s10 + $0x8] sm:$0xff] %vm66_vm2, %v1702_v4 }
0x2e0d   :  { %2234 = dma.done.wait [#allocation5], 64  }
0x2e0e   :  { %2235 = vsyncadd [#allocation5], 4294967232 }
0x2e0f   :  { %2236 = dma.done.wait [#allocation8], 64  }
0x2e10   :  { %2237 = vsyncadd [#allocation8], 4294967232 }
0x2e11   :  { %1741 = vsyncpa [#allocation4], 1 }
0x2e12   :  { %1742 = vsyncpa [#allocation5], 1 }
0x2e13   :  { %1743 = vsyncpa [#allocation8], 1 }

</bundles_post_ra>
